<compile_context>
chip_gen: v5e
topology: v5e:2x2
jax: 0.10.0
libtpu: 0.0.40
codegen_flags: <defaults>
</compile_context>

<pallas_src>
import jax
import jax.numpy as jnp
from jax.experimental import pallas as pl
from jax.experimental.pallas import tpu as pltpu

TB = 8            # batch rows per grid step (sublane-aligned output block)
C_PAD = 128       # channel (MXU-K) pad: lane-dense, full systolic depth
NC_PAD = 128      # class pad: lane-dense output store (no masked vst)
NEG_INF = -1e9    # pad-logit bias so padded class lanes vanish under softmax


def nima_kernel(x_ref, pool_ref, w1_ref, b1_ref, w2_ref, b2_ref, o_ref):
    # Backbone final stage: 1x1 pointwise conv == bf16 MXU matmul over channels,
    # f32 accumulate; bias add + ReLU6 stay in f32 (v5e has no bf16 VPU).
    z = jnp.dot(x_ref[...], w1_ref[...], preferred_element_type=jnp.float32)   # (TB*HW, 1280)
    z = jnp.clip(z + b1_ref[...], 0.0, 6.0)                                    # ReLU6

    # Global average pool folded into an MXU matmul with a block-constant 1/HW
    # matrix -- no in-kernel reshape / cross-sublane relayout-and-reduce.
    feat = jnp.dot(pool_ref[...], z, preferred_element_type=jnp.float32)       # (TB, 1280)

    # Head. The leading ReLU is a provable no-op here (feat >= 0), so it is omitted.
    # TODO(synk): Dropout(p=0.75) is identity in eval mode; training-mode RNG mask
    # is not implemented.
    logits = jnp.dot(feat.astype(jnp.bfloat16), w2_ref[...],
                     preferred_element_type=jnp.float32) + b2_ref[...]         # (TB, 128)

    # Softmax over the class axis in f32 (padded lanes carry -1e9 -> exp == 0).
    m = jnp.max(logits, axis=1, keepdims=True)
    e = jnp.exp(logits - m)
    o_ref[...] = e / jnp.sum(e, axis=1, keepdims=True)


@jax.jit
def nima_forward(x_nchw, w1, b1, w2, b2):
    n, c_in, h, w = x_nchw.shape
    hw = h * w
    feat_dim = w1.shape[1]
    nclass = w2.shape[1]
    n_pad = pl.cdiv(n, TB) * TB
    m_tile = TB * hw                       # matmul M rows per grid step

    # --- glue: NCHW -> lane-dense (N_pad*HW, C_pad) bf16 slab (flatten in wrapper) ---
    x = jnp.transpose(x_nchw, (0, 2, 3, 1)).reshape(n, hw, c_in)
    x = jnp.pad(x, ((0, n_pad - n), (0, 0), (0, C_PAD - c_in)))
    x = x.reshape(n_pad * hw, C_PAD).astype(jnp.bfloat16)

    w1p = jnp.pad(w1, ((0, C_PAD - c_in), (0, 0))).astype(jnp.bfloat16)        # zero rows: no-op
    b1p = b1.reshape(1, feat_dim).astype(jnp.float32)
    w2p = jnp.pad(w2, ((0, 0), (0, NC_PAD - nclass))).astype(jnp.bfloat16)     # zero cols
    b2p = jnp.pad(b2.reshape(1, nclass).astype(jnp.float32),
                  ((0, 0), (0, NC_PAD - nclass)), constant_values=NEG_INF)

    # Block-constant pooling matrix: pool[b, b*HW:(b+1)*HW] = 1/HW.
    rows = jax.lax.broadcasted_iota(jnp.int32, (TB, m_tile), 0)
    cols = jax.lax.broadcasted_iota(jnp.int32, (TB, m_tile), 1)
    pool = jnp.where(cols // hw == rows, 1.0 / hw, 0.0).astype(jnp.float32)

    cost = pl.CostEstimate(
        flops=2 * n_pad * hw * C_PAD * feat_dim          # 1x1 conv
        + 2 * n_pad * m_tile * feat_dim                  # pooling matmul
        + 2 * n_pad * feat_dim * NC_PAD,                 # head linear
        transcendentals=n_pad * NC_PAD,                  # softmax exp
        bytes_accessed=x.size * 2 + pool.size * 4 + w1p.size * 2 + b1p.size * 4
        + w2p.size * 2 + b2p.size * 4 + n_pad * NC_PAD * 4,
    )

    out = pl.pallas_call(
        nima_kernel,
        out_shape=jax.ShapeDtypeStruct((n_pad, NC_PAD), jnp.float32),
        grid_spec=pl.GridSpec(
            grid=(n_pad // TB,),                                     # batch-tiled, pipelined
            in_specs=[
                pl.BlockSpec((m_tile, C_PAD), lambda i: (i, 0)),     # x: tiled over batch
                pl.BlockSpec((TB, m_tile), lambda i: (0, 0)),        # pool: resident
                pl.BlockSpec((C_PAD, feat_dim), lambda i: (0, 0)),   # w1: resident
                pl.BlockSpec((1, feat_dim), lambda i: (0, 0)),       # b1: resident
                pl.BlockSpec((feat_dim, NC_PAD), lambda i: (0, 0)),  # w2: resident
                pl.BlockSpec((1, NC_PAD), lambda i: (0, 0)),         # b2: resident
            ],
            out_specs=pl.BlockSpec((TB, NC_PAD), lambda i: (i, 0)),  # lane-dense 128-wide
        ),
        compiler_params=pltpu.CompilerParams(
            dimension_semantics=("parallel",),   # batch tiles shard across TCs (v7x megacore)
        ),
        cost_estimate=cost,
    )(x, pool, w1p, b1p, w2p, b2p)

    return out[:n, :nclass]


if __name__ == "__main__":
    key = jax.random.PRNGKey(0)
    kx, kw1, kb1, kw2, kb2 = jax.random.split(key, 5)

    # Small deterministic shapes (backbone final-stage input: N x C_in x H x W).
    N, C_IN, H, W = 16, 32, 4, 4
    FEAT, NCLASS = 1280, 10

    x = jax.random.normal(kx, (N, C_IN, H, W), dtype=jnp.float32)            # NCHW input
    w1 = jax.random.normal(kw1, (C_IN, FEAT), dtype=jnp.float32) * 0.05      # 1x1 conv (BN folded)
    b1 = jax.random.normal(kb1, (FEAT,), dtype=jnp.float32) * 0.05
    w2 = jax.random.normal(kw2, (FEAT, NCLASS), dtype=jnp.float32) * 0.05    # nn.Linear(1280, 10)
    b2 = jax.random.normal(kb2, (NCLASS,), dtype=jnp.float32) * 0.05

    out = jax.block_until_ready(nima_forward(x, w1, b1, w2, b2))

    # Pure-JAX f32 reference of the same forward pass.
    xf = jnp.transpose(x, (0, 2, 3, 1)).reshape(N, H * W, C_IN)
    z = jnp.clip(jnp.einsum("nsc,cf->nsf", xf, w1) + b1, 0.0, 6.0)
    feat = z.mean(axis=1)
    ref = jax.nn.softmax(feat @ w2 + b2, axis=1)

    assert out.shape == (N, NCLASS)
    assert bool(jnp.all(jnp.abs(jnp.sum(out, axis=1) - 1.0) < 1e-5))         # softmax rows sum to 1
    assert bool(jnp.allclose(out, ref, atol=2e-2)), float(jnp.max(jnp.abs(out - ref)))
    print("KERNEL_OK")
</pallas_src>

<mosaic_0001>
module attributes {stable_mosaic.version = 11 : i64} {
  func.func @nima_kernel(%arg0: i32, %arg1: memref<128x128xbf16, #tpu.memory_space<vmem>>, %arg2: memref<8x128xf32, #tpu.memory_space<vmem>>, %arg3: memref<128x1280xbf16, #tpu.memory_space<vmem>>, %arg4: memref<1x1280xf32, #tpu.memory_space<vmem>>, %arg5: memref<1280x128xbf16, #tpu.memory_space<vmem>>, %arg6: memref<1x128xf32, #tpu.memory_space<vmem>>, %arg7: memref<8x128xf32, #tpu.memory_space<vmem>>) attributes {dimension_semantics = [#tpu.dimension_semantics<parallel>], iteration_bounds = array<i64: 2>, scalar_prefetch = 0 : i64, scratch_operands = 0 : i64, tpu.core_type = #tpu.core_type<tc>, window_params = [{transform_indices = @transform_0, window_bounds = array<i64: 128, 128>}, {pipeline_mode = #tpu.pipeline_mode<synchronous>, transform_indices = @transform_1, window_bounds = array<i64: 8, 128>}, {pipeline_mode = #tpu.pipeline_mode<synchronous>, transform_indices = @transform_2, window_bounds = array<i64: 128, 1280>}, {pipeline_mode = #tpu.pipeline_mode<synchronous>, transform_indices = @transform_3, window_bounds = array<i64: 1, 1280>}, {pipeline_mode = #tpu.pipeline_mode<synchronous>, transform_indices = @transform_4, window_bounds = array<i64: 1280, 128>}, {pipeline_mode = #tpu.pipeline_mode<synchronous>, transform_indices = @transform_5, window_bounds = array<i64: 1, 128>}, {transform_indices = @transform_6, window_bounds = array<i64: 8, 128>}]} {
    %c0 = arith.constant 0 : index
    %c0_0 = arith.constant 0 : index
    %0 = vector.load %arg1[%c0, %c0_0] : memref<128x128xbf16, #tpu.memory_space<vmem>>, vector<128x128xbf16>
    %c0_1 = arith.constant 0 : index
    %c0_2 = arith.constant 0 : index
    %1 = vector.load %arg3[%c0_1, %c0_2] : memref<128x1280xbf16, #tpu.memory_space<vmem>>, vector<128x1280xbf16>
    %cst = arith.constant dense<0.000000e+00> : vector<128x1280xf32>
    %2 = tpu.matmul %0, %1, %cst {dimension_numbers = #tpu.dot_dimension_numbers<[1], [0], [0], [1], [0, 0, 1, 1], [], []>} : vector<128x128xbf16>, vector<128x1280xbf16>, vector<128x1280xf32> -> vector<128x1280xf32>
    %c0_3 = arith.constant 0 : index
    %c0_4 = arith.constant 0 : index
    %3 = vector.load %arg4[%c0_3, %c0_4] : memref<1x1280xf32, #tpu.memory_space<vmem>>, vector<1x1280xf32>
    %4 = vector.broadcast %3 : vector<1x1280xf32> to vector<128x1280xf32>
    %5 = arith.addf %2, %4 : vector<128x1280xf32>
    %cst_5 = arith.constant 0.000000e+00 : f32
    %cst_6 = arith.constant 6.000000e+00 : f32
    %6 = vector.broadcast %cst_5 : f32 to vector<128x1280xf32>
    %7 = arith.maximumf %6, %5 : vector<128x1280xf32>
    %8 = vector.broadcast %cst_6 : f32 to vector<128x1280xf32>
    %9 = arith.minimumf %8, %7 : vector<128x1280xf32>
    %c0_7 = arith.constant 0 : index
    %c0_8 = arith.constant 0 : index
    %10 = vector.load %arg2[%c0_7, %c0_8] : memref<8x128xf32, #tpu.memory_space<vmem>>, vector<8x128xf32>
    %cst_9 = arith.constant dense<0.000000e+00> : vector<8x1280xf32>
    %11 = tpu.matmul %10, %9, %cst_9 {dimension_numbers = #tpu.dot_dimension_numbers<[1], [0], [0], [1], [0, 0, 1, 1], [], []>} : vector<8x128xf32>, vector<128x1280xf32>, vector<8x1280xf32> -> vector<8x1280xf32>
    %12 = arith.truncf %11 : vector<8x1280xf32> to vector<8x1280xbf16>
    %c0_10 = arith.constant 0 : index
    %c0_11 = arith.constant 0 : index
    %13 = vector.load %arg5[%c0_10, %c0_11] : memref<1280x128xbf16, #tpu.memory_space<vmem>>, vector<1280x128xbf16>
    %cst_12 = arith.constant dense<0.000000e+00> : vector<8x128xf32>
    %14 = tpu.matmul %12, %13, %cst_12 {dimension_numbers = #tpu.dot_dimension_numbers<[1], [0], [0], [1], [0, 0, 1, 1], [], []>} : vector<8x1280xbf16>, vector<1280x128xbf16>, vector<8x128xf32> -> vector<8x128xf32>
    %c0_13 = arith.constant 0 : index
    %c0_14 = arith.constant 0 : index
    %15 = vector.load %arg6[%c0_13, %c0_14] : memref<1x128xf32, #tpu.memory_space<vmem>>, vector<1x128xf32>
    %16 = vector.broadcast %15 : vector<1x128xf32> to vector<8x128xf32>
    %17 = arith.addf %14, %16 : vector<8x128xf32>
    %cst_15 = arith.constant dense<0xFF800000> : vector<8xf32>
    %18 = vector.multi_reduction <maximumf>, %17, %cst_15 [1] : vector<8x128xf32> to vector<8xf32>
    %19 = vector.shape_cast %18 : vector<8xf32> to vector<8x1xf32>
    %20 = vector.broadcast %19 : vector<8x1xf32> to vector<8x128xf32>
    %21 = arith.subf %17, %20 : vector<8x128xf32>
    %22 = math.exp %21 : vector<8x128xf32>
    %cst_16 = arith.constant dense<0.000000e+00> : vector<8xf32>
    %23 = vector.multi_reduction <add>, %22, %cst_16 [1] : vector<8x128xf32> to vector<8xf32>
    %24 = vector.shape_cast %23 : vector<8xf32> to vector<8x1xf32>
    %25 = vector.broadcast %24 : vector<8x1xf32> to vector<8x128xf32>
    %26 = arith.divf %22, %25 : vector<8x128xf32>
    %c0_17 = arith.constant 0 : index
    %c0_18 = arith.constant 0 : index
    %27 = vector.load %arg7[%c0_17, %c0_18] : memref<8x128xf32, #tpu.memory_space<vmem>>, vector<8x128xf32>
    tpu.vector_store %arg7[%c0_17, %c0_18], %26 {strides = array<i32>} : memref<8x128xf32, #tpu.memory_space<vmem>>, vector<8x128xf32>,
    return
  }
  func.func @transform_0(%arg0: i32) -> (i32, i32) {
    %c0_i32 = arith.constant 0 : i32
    %c0_i32_0 = arith.constant 0 : i32
    return %arg0, %c0_i32 : i32, i32
  }
  func.func @transform_1(%arg0: i32) -> (i32, i32) {
    %c0_i32 = arith.constant 0 : i32
    %c0_i32_0 = arith.constant 0 : i32
    %c0_i32_1 = arith.constant 0 : i32
    return %c0_i32, %c0_i32_0 : i32, i32
  }
  func.func @transform_2(%arg0: i32) -> (i32, i32) {
    %c0_i32 = arith.constant 0 : i32
    %c0_i32_0 = arith.constant 0 : i32
    %c0_i32_1 = arith.constant 0 : i32
    return %c0_i32, %c0_i32_0 : i32, i32
  }
  func.func @transform_3(%arg0: i32) -> (i32, i32) {
    %c0_i32 = arith.constant 0 : i32
    %c0_i32_0 = arith.constant 0 : i32
    %c0_i32_1 = arith.constant 0 : i32
    return %c0_i32, %c0_i32_0 : i32, i32
  }
  func.func @transform_4(%arg0: i32) -> (i32, i32) {
    %c0_i32 = arith.constant 0 : i32
    %c0_i32_0 = arith.constant 0 : i32
    %c0_i32_1 = arith.constant 0 : i32
    return %c0_i32, %c0_i32_0 : i32, i32
  }
  func.func @transform_5(%arg0: i32) -> (i32, i32) {
    %c0_i32 = arith.constant 0 : i32
    %c0_i32_0 = arith.constant 0 : i32
    %c0_i32_1 = arith.constant 0 : i32
    return %c0_i32, %c0_i32_0 : i32, i32
  }
  func.func @transform_6(%arg0: i32) -> (i32, i32) {
    %c0_i32 = arith.constant 0 : i32
    %c0_i32_0 = arith.constant 0 : i32
    return %arg0, %c0_i32 : i32, i32
  }
}

</mosaic_0001>

<bundles_post_ra>
// kernel: nima_forward.1
= control target key start
LH: loop header
LB: loop body
LE: loop exit
PB: predicated region body
PF: predicated region fallthrough
CT: control target
= control target key end

     0   :  { %11 = vsyncpa [#allocation3], 0  ;;  %s5198_s0 = inlined_call_operand.vmem [shape: bf16[256,128], index: 0, kind: input, shape index: {}]   ;;  %s5199_s1 = inlined_call_operand.vmem [shape: f32[8,128], index: 1, kind: input, shape index: {}]   ;;  %s5200_s2 = inlined_call_operand.vmem [shape: bf16[128,1280], index: 2, kind: input, shape index: {}]   ;;  %s5201_s3 = inlined_call_operand.vmem [shape: f32[1,1280], index: 3, kind: input, shape index: {}]   ;;  %s5202_s4 = inlined_call_operand.vmem [shape: bf16[1280,128], index: 4, kind: input, shape index: {}]   ;;  %s5203_s5 = inlined_call_operand.vmem [shape: f32[1,128], index: 5, kind: input, shape index: {}]   ;;  %s5204_s6 = inlined_call_operand.hbm [shape: f32[16,128], index: 6, kind: output, shape index: {}]  }
   0x1   :  { %13 = vsyncpa [#allocation3 + $0x1], 0  ;;  %s3713_s21 = smov 0   ;;  %s3715_s22 = smov 0  }
   0x2   :  { %s3717_s23 = smov 0   ;;  %s3719_s24 = smov 0  }
   0x3 LB: > { %s3734_s25 = sadd.s32 4294967295, %s3676_s24   ;;  %s2713_s26 = sadd.s32 4294967294, %s3676_s24   ;;  %s3676_s24 = sphi %s3719_s24, %s5267_s24   ;;  %s3672_s23 = sphi %s3717_s23, %s5266_s23   ;;  %s3668_s22 = sphi %s3715_s22, %s5265_s22   ;;  %s3664_s21 = sphi %s3713_s21, %s5264_s21  }
   0x4   : > { %s3738_s27 = sadd.s32 1, %s3676_s24   ;;  %s157_s28 = sadd.s32 1, %s3672_s23 }
   0x5   : > { %s154_s29 = ssub.s32 %s3676_s24, %s3738_s27  ;;  %p167_p0 = scmp.ne.s32.totalorder %s3672_s23, %s3668_s22 }
   0x6   : > { %p155_p1 = scmp.eq.s32.totalorder %s154_s29, 0  ;;  %p168_p2 = scmp.eq.s32.totalorder %s3734_s25, 1 }
   0x7   : > { %p173_p3 = scmp.ne.s32.totalorder %s3668_s22, %s3664_s21  ;;  %p174_p4 = scmp.eq.s32.totalorder %s2713_s26, 1 }
   0x8   : > { %s3749_s30 = scalar_select %p155_p1, %s3672_s23, %s157_s28  }
   0x9   : > { %p3751_p5 = por %p168_p2, %p167_p0  ;;  %p3755_p6 = por %p174_p4, %p173_p3 }
   0xa   : > { %p2716_p7 = scmp.ge.s32.totalorder %s3676_s24, 1  ;;  %p216_p8 = scmp.lt.s32.totalorder %s3676_s24, 3 }
   0xc   : > { %p217_p9 = pnand %p2716_p7, %p216_p8 }
   0xe   : > { %220 = sbr.rel (%p217_p9) target bundleno = 1121 (0x461), region = 44 }
  0x13   : > { %v3034_v0 = vld [vmem:[%s5200_s2 + $0x230] sm:$0xf]  ;;  %v3479_v1 = vld [vmem:[%s5200_s2 + $0x254] sm:$0xf0]  ;;  %v3474_v2 = vld [vmem:[%s5200_s2 + $0x234] sm:$0xf] }
  0x14   : > { %v3035_v3 = vor.u32 %v3479_v1, %v3034_v0  ;;  %v3036_v4 = vld [vmem:[%s5200_s2 + $0x258] sm:$0xf0]  ;;  %v2994_v5 = vld [vmem:[%s5200_s2 + $0x1e0] sm:$0xf]  ;;  %v3469_v6 = vld [vmem:[%s5200_s2 + $0x204] sm:$0xf0] }
  0x15   : > { %v3039_v7 = vor.u32 %v3474_v2, %v3036_v4  ;;  %v3464_v8 = vld [vmem:[%s5200_s2 + $0x1e4] sm:$0xf]  ;;  %v2996_v9 = vld [vmem:[%s5200_s2 + $0x208] sm:$0xf0]  ;;  %v2995_v10 = vor.u32 %v3469_v6, %v2994_v5  ;;  %v2954_v12 = vld [vmem:[%s5200_s2 + $0x190] sm:$0xf] }
  0x16   : > { %820 = vmatpush.bf16.msra.mxu0 %v3035_v3  ;;  %v2999_v11 = vor.u32 %v3464_v8, %v2996_v9  ;;  %v3459_v13 = vld [vmem:[%s5200_s2 + $0x1b4] sm:$0xf0]  ;;  %v3454_v14 = vld [vmem:[%s5200_s2 + $0x194] sm:$0xf]  ;;  %v2956_v15 = vld [vmem:[%s5200_s2 + $0x1b8] sm:$0xf0] }
  0x17   : > { %869 = vmatpush.bf16.msra.mxu1 %v3039_v7  ;;  %v2955_v16 = vor.u32 %v3459_v13, %v2954_v12  ;;  %v2959_v17 = vor.u32 %v3454_v14, %v2956_v15  ;;  %v2914_v18 = vld [vmem:[%s5200_s2 + $0x140] sm:$0xf]  ;;  %v3449_v19 = vld [vmem:[%s5200_s2 + $0x164] sm:$0xf0]  ;;  %v3444_v20 = vld [vmem:[%s5200_s2 + $0x144] sm:$0xf] }
  0x18   : > { %v2916_v21 = vld [vmem:[%s5200_s2 + $0x168] sm:$0xf0]  ;;  %v2874_v22 = vld [vmem:[%s5200_s2 + $0xf0] sm:$0xf]  ;;  %v3439_v23 = vld [vmem:[%s5200_s2 + $0x114] sm:$0xf0]  ;;  %v2915_v24 = vor.u32 %v3449_v19, %v2914_v18 }
  0x19   : > { %v3434_v25 = vld [vmem:[%s5200_s2 + $0xf4] sm:$0xf]  ;;  %v2876_v26 = vld [vmem:[%s5200_s2 + $0x118] sm:$0xf0]  ;;  %v3042_v27 = vld [vmem:[%s5200_s2 + $0x238] sm:$0xf]  ;;  %v2919_v29 = vor.u32 %v3444_v20, %v2916_v21  ;;  %v2875_v40 = vor.u32 %v3439_v23, %v2874_v22 }
  0x1a   : > { %821 = vmatpush.bf16.msra.mxu0 %v2995_v10  ;;  %v3480_v28 = vld [vmem:[%s5200_s2 + $0x25c] sm:$0xf0]  ;;  %v3475_v31 = vld [vmem:[%s5200_s2 + $0x23c] sm:$0xf]  ;;  %v3044_v32 = vld [vmem:[%s5200_s2 + $0x260] sm:$0xf0]  ;;  %v2879_v45 = vor.u32 %v3434_v25, %v2876_v26 }
  0x1b   : > { %870 = vmatpush.bf16.msra.mxu1 %v2999_v11  ;;  %v3043_v30 = vor.u32 %v3480_v28, %v3042_v27  ;;  %v3002_v33 = vld [vmem:[%s5200_s2 + $0x1e8] sm:$0xf]  ;;  %s2718_s14 = sshll.u32 %s3734_s25, 4  ;;  %v3047_v34 = vor.u32 %v3475_v31, %v3044_v32  ;;  %v3470_v35 = vld [vmem:[%s5200_s2 + $0x20c] sm:$0xf0]  ;;  %s243_s12 = sand.u32 1, %s3668_s22  }
  0x1c   : > { %v3465_v36 = vld [vmem:[%s5200_s2 + $0x1ec] sm:$0xf]  ;;  %v2834_v37 = vld [vmem:[%s5200_s2 + $0xa0] sm:$0xf]  ;;  %v3003_v38 = vor.u32 %v3470_v35, %v3002_v33  ;;  %v3004_v39 = vld [vmem:[%s5200_s2 + $0x210] sm:$0xf0] }
  0x1d   : > { %918 = vmatpush.bf16.msra.mxu2 %v3043_v30  ;;  %v3429_v41 = vld [vmem:[%s5200_s2 + $0xc4] sm:$0xf0]  ;;  %967 = vmatpush.bf16.msra.mxu3 %v3047_v34  ;;  %v3007_v42 = vor.u32 %v3465_v36, %v3004_v39  ;;  %v2962_v43 = vld [vmem:[%s5200_s2 + $0x198] sm:$0xf]  ;;  %v3460_v44 = vld [vmem:[%s5200_s2 + $0x1bc] sm:$0xf0] }
  0x1e   : > { %822 = vmatpush.bf16.msra.mxu0 %v2955_v16  ;;  %p3860_p10 = scmp.lt.s32.totalorder %s2718_s14, 31  ;;  %v3455_v46 = vld [vmem:[%s5200_s2 + $0x19c] sm:$0xf]  ;;  %v2964_v47 = vld [vmem:[%s5200_s2 + $0x1c0] sm:$0xf0]  ;;  %v2963_v51 = vor.u32 %v3460_v44, %v2962_v43  ;;  %v2835_v52 = vor.u32 %v3429_v41, %v2834_v37  ;;  %s3393_s13 = sshll.u32 %s3734_s25, 3 }
  0x1f   : > { %871 = vmatpush.bf16.msra.mxu1 %v2959_v17  ;;  %v3424_v48 = vld [vmem:[%s5200_s2 + $0xa4] sm:$0xf]  ;;  %v2836_v49 = vld [vmem:[%s5200_s2 + $0xc8] sm:$0xf0]  ;;  %v2794_v50 = vld [vmem:[%s5200_s2 + $0x50] sm:$0xf]  ;;  %v2967_v54 = vor.u32 %v3455_v46, %v2964_v47  ;;  %s2649_s16 = scalar_lea.hbm %s5204_s6, %s3393_s13 }
  0x20   : > { %v3419_v53 = vld [vmem:[%s5200_s2 + $0x74] sm:$0xf0]  ;;  %v2922_v55 = vld [vmem:[%s5200_s2 + $0x148] sm:$0xf]  ;;  %v3450_v56 = vld [vmem:[%s5200_s2 + $0x16c] sm:$0xf0]  ;;  %v2839_v57 = vor.u32 %v3424_v48, %v2836_v49 }
  0x21   : > { %919 = vmatpush.bf16.msra.mxu2 %v3003_v38  ;;  %968 = vmatpush.bf16.msra.mxu3 %v3007_v42  ;;  %s5269_s14 = smov (!%p3860_p10, %s2718_s14), 31  ;;  %v3445_v58 = vld [vmem:[%s5200_s2 + $0x14c] sm:$0xf]  ;;  %v2924_v59 = vld [vmem:[%s5200_s2 + $0x170] sm:$0xf0]  ;;  %v2923_v0 = vor.u32 %v3450_v56, %v2922_v55  ;;  %v2795_v1 = vor.u32 %v3419_v53, %v2794_v50  ;;  %s2653_s20 = sshll.u32 %s2649_s16, 4  ;;  %s2654_s20 = int_to_ptr.hbm [resolvable:$true] %s2653_s20 }
  0x22   : > { %823 = vmatpush.bf16.msra.mxu0 %v2915_v24  ;;  %v3414_v60 = vld [vmem:[%s5200_s2 + $0x54] sm:$0xf]  ;;  %v2796_v61 = vld [vmem:[%s5200_s2 + $0x78] sm:$0xf0]  ;;  %v2754_v62 = vld [vmem:[%s5200_s2] sm:$0xf]  ;;  %v2927_v2 = vor.u32 %v3445_v58, %v2924_v59 }
  0x23   : > { %872 = vmatpush.bf16.msra.mxu1 %v2919_v29  ;;  %v3409_v63 = vld [vmem:[%s5200_s2 + $0x24] sm:$0xf0]  ;;  %v2882_v3 = vld [vmem:[%s5200_s2 + $0xf8] sm:$0xf]  ;;  %v3440_v4 = vld [vmem:[%s5200_s2 + $0x11c] sm:$0xf0]  ;;  %v2799_v5 = vor.u32 %v3414_v60, %v2796_v61 }
  0x24   : > { %s2719_s26 = sshll.u32 %s5269_s14, 2  ;;  %v3435_v6 = vld [vmem:[%s5200_s2 + $0xfc] sm:$0xf]  ;;  %v2884_v7 = vld [vmem:[%s5200_s2 + $0x120] sm:$0xf0]  ;;  %v2883_v10 = vor.u32 %v3440_v4, %v2882_v3  ;;  %v2755_v11 = vor.u32 %v3409_v63, %v2754_v62  ;;  %s2639_s25 = scalar_lea.sflag [#allocation3], %s243_s12 }
  0x25   : > { %920 = vmatpush.bf16.msra.mxu2 %v2963_v51  ;;  %969 = vmatpush.bf16.msra.mxu3 %v2967_v54  ;;  %v3404_v8 = vld [vmem:[%s5200_s2 + $0x4] sm:$0xf]  ;;  %v2756_v9 = vld [vmem:[%s5200_s2 + $0x28] sm:$0xf0]  ;;  %s3931_s17 = scalar_lea.vmem %s5198_s0, %s2719_s26  ;;  %v2887_v12 = vor.u32 %v3435_v6, %v2884_v7  ;;  %v2842_v13 = vld [vmem:[%s5200_s2 + $0xa8] sm:$0xf] }
  0x26   : > { %824 = vmatpush.bf16.msra.mxu0 %v2875_v40  ;;  %v3430_v14 = vld [vmem:[%s5200_s2 + $0xcc] sm:$0xf0]  ;;  %v2759_v15 = vor.u32 %v3404_v8, %v2756_v9  ;;  %v3425_v16 = vld [vmem:[%s5200_s2 + $0xac] sm:$0xf]  ;;  %v2844_v17 = vld [vmem:[%s5200_s2 + $0xd0] sm:$0xf0] }
  0x27   : > { %873 = vmatpush.bf16.msra.mxu1 %v2879_v45  ;;  %v3946_v18 = vld [vmem:[%s3931_s17] sm:$0xff]  ;;  %v2843_v19 = vor.u32 %v3430_v14, %v2842_v13  ;;  %v2847_v20 = vor.u32 %v3425_v16, %v2844_v17  ;;  %v2802_v21 = vld [vmem:[%s5200_s2 + $0x58] sm:$0xf]  ;;  %v3415_v23 = vld [vmem:[%s5200_s2 + $0x5c] sm:$0xf]  ;;  %s3628_s28 = sshra.s32 %s2654_s20, 4  ;;  %s3629_s28 = int_to_ptr.hbm [resolvable:$true] %s3628_s28 }
  0x28   : > { %v3420_v22 = vld [vmem:[%s5200_s2 + $0x7c] sm:$0xf0]  ;;  %v2804_v24 = vld [vmem:[%s5200_s2 + $0x80] sm:$0xf0]  ;;  %v2762_v27 = vld [vmem:[%s5200_s2 + $0x8] sm:$0xf]  ;;  %p3635_p0 = scmp.lt.s32.totalorder %s3629_s28, %s5204_s6 }
  0x29   : > { %921 = vmatpush.bf16.msra.mxu2 %v2923_v0  ;;  %970 = vmatpush.bf16.msra.mxu3 %v2927_v2  ;;  %v2803_v25 = vor.u32 %v3420_v22, %v2802_v21  ;;  %v2807_v26 = vor.u32 %v3415_v23, %v2804_v24  ;;  %v3410_v28 = vld [vmem:[%s5200_s2 + $0x2c] sm:$0xf0]  ;;  %v3405_v29 = vld [vmem:[%s5200_s2 + $0xc] sm:$0xf]  ;;  %v2764_v30 = vld [vmem:[%s5200_s2 + $0x30] sm:$0xf0] }
  0x2a   : > { %825 = vmatpush.bf16.msra.mxu0 %v2835_v52  ;;  %v2763_v31 = vor.u32 %v3410_v28, %v2762_v27  ;;  %v2767_v32 = vor.u32 %v3405_v29, %v2764_v30  ;;  %v3976_v33 = vld [vmem:[%s3931_s17 + $0x8] sm:$0xff]  ;;  %v3983_v34 = vld [vmem:[%s3931_s17 + $0x10] sm:$0xff]  ;;  %v3990_v35 = vld [vmem:[%s3931_s17 + $0x18] sm:$0xff]  ;;  %s3630_s29 = scalar_lea.hbm %s3629_s28, 8  ;;  %s3634_s26 = scalar_lea.hbm %s5204_s6, 16 }
  0x2b   : > { %874 = vmatpush.bf16.msra.mxu1 %v2839_v57  ;;  %v3997_v36 = vld [vmem:[%s3931_s17 + $0x20] sm:$0xff]  ;;  %v3481_v38 = vld [vmem:[%s5200_s2 + $0x264] sm:$0xf0]  ;;  %v3052_v41 = vld [vmem:[%s5200_s2 + $0x268] sm:$0xf0]  ;;  %p3631_p11 = scmp.ne.s32.totalorder %s3629_s28, %s3630_s29  ;;  %p3636_p1 = scmp.lt.s32.totalorder %s3634_s26, %s3630_s29 }
  0x2c   : > { %v3050_v37 = vld [vmem:[%s5200_s2 + $0x240] sm:$0xf]  ;;  %v3476_v39 = vld [vmem:[%s5200_s2 + $0x244] sm:$0xf]  ;;  %v3010_v43 = vld [vmem:[%s5200_s2 + $0x1f0] sm:$0xf] }
  0x2d   : > { %922 = vmatpush.bf16.msra.mxu2 %v2883_v10  ;;  %971 = vmatpush.bf16.msra.mxu3 %v2887_v12  ;;  %v3051_v40 = vor.u32 %v3481_v38, %v3050_v37  ;;  %v3055_v42 = vor.u32 %v3476_v39, %v3052_v41  ;;  %v3471_v44 = vld [vmem:[%s5200_s2 + $0x214] sm:$0xf0]  ;;  %v3466_v45 = vld [vmem:[%s5200_s2 + $0x1f4] sm:$0xf]  ;;  %v3012_v47 = vld [vmem:[%s5200_s2 + $0x218] sm:$0xf0]  ;;  %p3632_p12 = pnand %p3631_p11, %p3751_p5  ;;  %p3637_p2 = por %p3636_p1, %p3635_p0 }
  0x2e   : > { %826 = vmatpush.bf16.msra.mxu0 %v2795_v1  ;;  %v3011_v46 = vor.u32 %v3471_v44, %v3010_v43  ;;  %v3015_v48 = vor.u32 %v3466_v45, %v3012_v47  ;;  %v2970_v49 = vld [vmem:[%s5200_s2 + $0x1a0] sm:$0xf]  ;;  %v3461_v50 = vld [vmem:[%s5200_s2 + $0x1c4] sm:$0xf0]  ;;  %v3456_v51 = vld [vmem:[%s5200_s2 + $0x1a4] sm:$0xf] }
  0x2f   : > { %875 = vmatpush.bf16.msra.mxu1 %v2799_v5  ;;  %v2972_v52 = vld [vmem:[%s5200_s2 + $0x1c8] sm:$0xf0]  ;;  %v2971_v53 = vor.u32 %v3461_v50, %v2970_v49  ;;  %v2930_v55 = vld [vmem:[%s5200_s2 + $0x150] sm:$0xf]  ;;  %v3451_v56 = vld [vmem:[%s5200_s2 + $0x174] sm:$0xf0]  ;;  %p3633_p13 = pneg %p3632_p12 }
  0x30   : > { %v2975_v54 = vor.u32 %v3456_v51, %v2972_v52  ;;  %v3446_v57 = vld [vmem:[%s5200_s2 + $0x154] sm:$0xf]  ;;  %v2932_v58 = vld [vmem:[%s5200_s2 + $0x178] sm:$0xf0]  ;;  %v2931_v59 = vor.u32 %v3451_v56, %v2930_v55  ;;  %v4052_v61 = vld [vmem:[%s3931_s17 + $0x28] sm:$0xff] }
  0x31   : > { %923 = vmatpush.bf16.msra.mxu2 %v2843_v19  ;;  %972 = vmatpush.bf16.msra.mxu3 %v2847_v20  ;;  %v2935_v60 = vor.u32 %v3446_v57, %v2932_v58  ;;  %v2890_v62 = vld [vmem:[%s5200_s2 + $0x100] sm:$0xf]  ;;  %v3441_v63 = vld [vmem:[%s5200_s2 + $0x124] sm:$0xf0]  ;;  %v3436_v0 = vld [vmem:[%s5200_s2 + $0x104] sm:$0xf]  ;;  %p3638_p3 = pnand %p3637_p2, %p3633_p13 }
  0x32   : > { %827 = vmatpush.bf16.msra.mxu0 %v2755_v11  ;;  %v2891_v1 = vor.u32 %v3441_v63, %v2890_v62  ;;  %v2892_v2 = vld [vmem:[%s5200_s2 + $0x128] sm:$0xf0]  ;;  %v2850_v4 = vld [vmem:[%s5200_s2 + $0xb0] sm:$0xf]  ;;  %v3431_v5 = vld [vmem:[%s5200_s2 + $0xd4] sm:$0xf0] }
  0x33   : > { %876 = vmatpush.bf16.msra.mxu1 %v2759_v15  ;;  %v2895_v3 = vor.u32 %v3436_v0, %v2892_v2  ;;  %v3426_v6 = vld [vmem:[%s5200_s2 + $0xb4] sm:$0xf]  ;;  %v2851_v7 = vor.u32 %v3431_v5, %v2850_v4  ;;  %v2852_v8 = vld [vmem:[%s5200_s2 + $0xd8] sm:$0xf0]  ;;  %v2810_v10 = vld [vmem:[%s5200_s2 + $0x60] sm:$0xf] }
  0x34   : > { %v2855_v9 = vor.u32 %v3426_v6, %v2852_v8  ;;  %v3421_v11 = vld [vmem:[%s5200_s2 + $0x84] sm:$0xf0]  ;;  %v3416_v12 = vld [vmem:[%s5200_s2 + $0x64] sm:$0xf]  ;;  %v2812_v13 = vld [vmem:[%s5200_s2 + $0x88] sm:$0xf0] }
  0x35   : > { %828 = vmatmul.bf16.vlgmr.msra.gmra.mxu0 %v3946_v18  ;;  %924 = vmatpush.bf16.msra.mxu2 %v2803_v25  ;;  %v2811_v14 = vor.u32 %v3421_v11, %v2810_v10  ;;  %v2815_v15 = vor.u32 %v3416_v12, %v2812_v13  ;;  %v3058_v16 = vld [vmem:[%s5200_s2 + $0x248] sm:$0xf]  ;;  %v3482_v17 = vld [vmem:[%s5200_s2 + $0x26c] sm:$0xf0]  ;;  %v3477_v19 = vld [vmem:[%s5200_s2 + $0x24c] sm:$0xf] }
  0x36   : > { %877 = vmatmul.bf16.vlgmr.msra.gmra.mxu1 %v3946_v18  ;;  %973 = vmatpush.bf16.msra.mxu3 %v2807_v26  ;;  %v3059_v20 = vor.u32 %v3482_v17, %v3058_v16  ;;  %v3060_v21 = vld [vmem:[%s5200_s2 + $0x270] sm:$0xf0]  ;;  %v2770_v24 = vld [vmem:[%s5200_s2 + $0x10] sm:$0xf]  ;;  %v3411_v25 = vld [vmem:[%s5200_s2 + $0x34] sm:$0xf0] }
  0x37   : > { %1016 = vmatpush.bf16.msrb.mxu0 %v3051_v40  ;;  %1065 = vmatpush.bf16.msrb.mxu1 %v3055_v42  ;;  %v4106_v22 = vld [vmem:[%s3931_s17 + $0x30] sm:$0xff]  ;;  %v3063_v23 = vor.u32 %v3477_v19, %v3060_v21  ;;  %v2771_v27 = vor.u32 %v3411_v25, %v2770_v24  ;;  %v2772_v28 = vld [vmem:[%s5200_s2 + $0x38] sm:$0xf0]  ;;  %v3018_v29 = vld [vmem:[%s5200_s2 + $0x1f8] sm:$0xf] }
  0x38   : > { %v3406_v26 = vld [vmem:[%s5200_s2 + $0x14] sm:$0xf]  ;;  %v3472_v30 = vld [vmem:[%s5200_s2 + $0x21c] sm:$0xf0]  ;;  %v3467_v37 = vld [vmem:[%s5200_s2 + $0x1fc] sm:$0xf] }
  0x39   : > { %925 = vmatpush.bf16.msra.mxu2 %v2763_v31  ;;  %v2775_v31 = vor.u32 %v3406_v26, %v2772_v28  ;;  %v3020_v38 = vld [vmem:[%s5200_s2 + $0x220] sm:$0xf0]  ;;  %v2978_v40 = vld [vmem:[%s5200_s2 + $0x1a8] sm:$0xf]  ;;  %v3462_v41 = vld [vmem:[%s5200_s2 + $0x1cc] sm:$0xf0] }
  0x3a   : > { %974 = vmatpush.bf16.msra.mxu3 %v2767_v32  ;;  %v3019_v32 = vor.u32 %v3472_v30, %v3018_v29  ;;  %v3023_v39 = vor.u32 %v3467_v37, %v3020_v38  ;;  %v3457_v42 = vld [vmem:[%s5200_s2 + $0x1ac] sm:$0xf]  ;;  %v2979_v43 = vor.u32 %v3462_v41, %v2978_v40  ;;  %v2980_v44 = vld [vmem:[%s5200_s2 + $0x1d0] sm:$0xf0]  ;;  %v3452_v47 = vld [vmem:[%s5200_s2 + $0x17c] sm:$0xf0] }
  0x3b   : > { %1017 = vmatpush.bf16.msrb.mxu0 %v3011_v46  ;;  %1066 = vmatpush.bf16.msrb.mxu1 %v3015_v48  ;;  %v2983_v45 = vor.u32 %v3457_v42, %v2980_v44  ;;  %v2938_v46 = vld [vmem:[%s5200_s2 + $0x158] sm:$0xf]  ;;  %v3447_v48 = vld [vmem:[%s5200_s2 + $0x15c] sm:$0xf]  ;;  %v2940_v50 = vld [vmem:[%s5200_s2 + $0x180] sm:$0xf0] }
  0x3c   : > { %926 = vmatmul.bf16.vlgmr.msra.gmra.mxu2 %v3946_v18  ;;  %v2939_v49 = vor.u32 %v3452_v47, %v2938_v46  ;;  %v2943_v51 = vor.u32 %v3447_v48, %v2940_v50  ;;  %v2898_v52 = vld [vmem:[%s5200_s2 + $0x108] sm:$0xf]  ;;  %v2900_v56 = vld [vmem:[%s5200_s2 + $0x130] sm:$0xf0]  ;;  %v4173_v58 = vld [vmem:[%s3931_s17 + $0x38] sm:$0xff] }
  0x3d   : > { %975 = vmatmul.bf16.vlgmr.msra.gmra.mxu3 %v3946_v18  ;;  %1114 = vmatpush.bf16.msrb.mxu2 %v3059_v20  ;;  %v3427_v62 = vld [vmem:[%s5200_s2 + $0xbc] sm:$0xf]  ;;  %v2860_v0 = vld [vmem:[%s5200_s2 + $0xe0] sm:$0xf0]  ;;  %v2818_v2 = vld [vmem:[%s5200_s2 + $0x68] sm:$0xf] }
  0x3e   : > { %1163 = vmatpush.bf16.msrb.mxu3 %v3063_v23  ;;  %v3417_v4 = vld [vmem:[%s5200_s2 + $0x6c] sm:$0xf]  ;;  %v2820_v6 = vld [vmem:[%s5200_s2 + $0x90] sm:$0xf0]  ;;  %v2778_v8 = vld [vmem:[%s5200_s2 + $0x18] sm:$0xf] }
  0x3f   : > { %1018 = vmatpush.bf16.msrb.mxu0 %v2971_v53  ;;  %1067 = vmatpush.bf16.msrb.mxu1 %v2975_v54  ;;  %v3442_v53 = vld [vmem:[%s5200_s2 + $0x12c] sm:$0xf0]  ;;  %v3437_v54 = vld [vmem:[%s5200_s2 + $0x10c] sm:$0xf]  ;;  %v3407_v10 = vld [vmem:[%s5200_s2 + $0x1c] sm:$0xf] }
  0x40   : > { %v2899_v55 = vor.u32 %v3442_v53, %v2898_v52  ;;  %v2903_v57 = vor.u32 %v3437_v54, %v2900_v56  ;;  %v2780_v12 = vld [vmem:[%s5200_s2 + $0x40] sm:$0xf0]  ;;  %v3066_v50 = vld [vmem:[%s5200_s2 + $0x250] sm:$0xf]  ;;  %v3068_v54 = vld [vmem:[%s5200_s2 + $0x278] sm:$0xf0] }
  0x41   : > { %1115 = vmatpush.bf16.msrb.mxu2 %v3019_v32  ;;  %v2783_v13 = vor.u32 %v3407_v10, %v2780_v12  ;;  %v3026_v56 = vld [vmem:[%s5200_s2 + $0x200] sm:$0xf] }
  0x42   : > { %1164 = vmatpush.bf16.msrb.mxu3 %v3023_v39  ;;  %v2946_v10 = vld [vmem:[%s5200_s2 + $0x160] sm:$0xf] }
  0x43   : > { %1019 = vmatpush.bf16.msrb.mxu0 %v2931_v59  ;;  %1068 = vmatpush.bf16.msrb.mxu1 %v2935_v60  ;;  %v2858_v59 = vld [vmem:[%s5200_s2 + $0xb8] sm:$0xf]  ;;  %v3432_v60 = vld [vmem:[%s5200_s2 + $0xdc] sm:$0xf0] }
  0x44   : > { %v2859_v63 = vor.u32 %v3432_v60, %v2858_v59  ;;  %v3468_v60 = vld [vmem:[%s5200_s2 + $0x204] sm:$0xf] }
  0x45   : > { %833 = vmatmul.bf16.gmra.mxu0 %v3976_v33  ;;  %1116 = vmatpush.bf16.msrb.mxu2 %v2979_v43 }
  0x46   : > { %882 = vmatmul.bf16.gmra.mxu1 %v3976_v33  ;;  %1165 = vmatpush.bf16.msrb.mxu3 %v2983_v45 }
  0x47   : > { %1020 = vmatpush.bf16.msrb.mxu0 %v2891_v1  ;;  %1069 = vmatpush.bf16.msrb.mxu1 %v2895_v3  ;;  %v2863_v1 = vor.u32 %v3427_v62, %v2860_v0  ;;  %v3422_v3 = vld [vmem:[%s5200_s2 + $0x8c] sm:$0xf0]  ;;  %v3028_v62 = vld [vmem:[%s5200_s2 + $0x228] sm:$0xf0] }
  0x48   : > { %v2819_v5 = vor.u32 %v3422_v3, %v2818_v2  ;;  %v3031_v0 = vor.u32 %v3468_v60, %v3028_v62  ;;  %v2986_v3 = vld [vmem:[%s5200_s2 + $0x1b0] sm:$0xf]  ;;  %v2908_v60 = vld [vmem:[%s5200_s2 + $0x138] sm:$0xf0] }
  0x49   : > { %1117 = vmatpush.bf16.msrb.mxu2 %v2939_v49 }
  0x4a   : > { %1166 = vmatpush.bf16.msrb.mxu3 %v2943_v51  ;;  %v3483_v51 = vld [vmem:[%s5200_s2 + $0x274] sm:$0xf0] }
  0x4b   : > { %1021 = vmatpush.bf16.msrb.mxu0 %v2851_v7  ;;  %1070 = vmatpush.bf16.msrb.mxu1 %v2855_v9  ;;  %v2823_v7 = vor.u32 %v3417_v4, %v2820_v6  ;;  %v3412_v9 = vld [vmem:[%s5200_s2 + $0x3c] sm:$0xf0]  ;;  %v3067_v53 = vor.u32 %v3483_v51, %v3066_v50  ;;  %v3463_v4 = vld [vmem:[%s5200_s2 + $0x1d4] sm:$0xf0]  ;;  %v2948_v50 = vld [vmem:[%s5200_s2 + $0x188] sm:$0xf0] }
  0x4c   : > { %931 = vmatmul.bf16.gmra.mxu2 %v3976_v33  ;;  %v2779_v11 = vor.u32 %v3412_v9, %v2778_v8  ;;  %v2987_v6 = vor.u32 %v3463_v4, %v2986_v3  ;;  %v2988_v8 = vld [vmem:[%s5200_s2 + $0x1d8] sm:$0xf0]  ;;  %v3433_v3 = vld [vmem:[%s5200_s2 + $0xe4] sm:$0xf0] }
  0x4d   : > { %980 = vmatmul.bf16.gmra.mxu3 %v3976_v33  ;;  %1118 = vmatpush.bf16.msrb.mxu2 %v2899_v55 }
  0x4e   : > { %1167 = vmatpush.bf16.msrb.mxu3 %v2903_v57  ;;  %v3473_v57 = vld [vmem:[%s5200_s2 + $0x224] sm:$0xf0] }
  0x4f   : > { %1022 = vmatpush.bf16.msrb.mxu0 %v2811_v14  ;;  %1071 = vmatpush.bf16.msrb.mxu1 %v2815_v15  ;;  %v3027_v59 = vor.u32 %v3473_v57, %v3026_v56  ;;  %v3443_v56 = vld [vmem:[%s5200_s2 + $0x134] sm:$0xf0] }
  0x51   : > { %1119 = vmatpush.bf16.msrb.mxu2 %v2859_v63 }
  0x52   : > { %1168 = vmatpush.bf16.msrb.mxu3 %v2863_v1 }
  0x53   : > { %1023 = vmatpush.bf16.msrb.mxu0 %v2771_v27  ;;  %1072 = vmatpush.bf16.msrb.mxu1 %v2775_v31 }
  0x55   : > { %838 = vmatmul.bf16.gmra.mxu0 %v3983_v34  ;;  %1120 = vmatpush.bf16.msrb.mxu2 %v2819_v5 }
  0x56   : > { %887 = vmatmul.bf16.gmra.mxu1 %v3983_v34  ;;  %1169 = vmatpush.bf16.msrb.mxu3 %v2823_v7  ;;  %v3458_v7 = vld [vmem:[%s5200_s2 + $0x1b4] sm:$0xf] }
  0x57   : > { %1212 = vmatpush.bf16.msra.mxu0 %v3067_v53  ;;  %v2991_v9 = vor.u32 %v3458_v7, %v2988_v8  ;;  %v2868_v7 = vld [vmem:[%s5200_s2 + $0xe8] sm:$0xf0] }
  0x59   : > { %1121 = vmatpush.bf16.msrb.mxu2 %v2779_v11  ;;  %v3453_v11 = vld [vmem:[%s5200_s2 + $0x184] sm:$0xf0] }
  0x5a   : > { %1170 = vmatpush.bf16.msrb.mxu3 %v2783_v13  ;;  %v2947_v12 = vor.u32 %v3453_v11, %v2946_v10  ;;  %v3448_v13 = vld [vmem:[%s5200_s2 + $0x164] sm:$0xf] }
  0x5b   : > { %1213 = vmatpush.bf16.msra.mxu0 %v3027_v59  ;;  %v2951_v53 = vor.u32 %v3448_v13, %v2948_v50  ;;  %v3438_v59 = vld [vmem:[%s5200_s2 + $0x114] sm:$0xf]  ;;  %v3423_v13 = vld [vmem:[%s5200_s2 + $0x94] sm:$0xf0] }
  0x5c   : > { %936 = vmatmul.bf16.gmra.mxu2 %v3983_v34  ;;  %v2911_v62 = vor.u32 %v3438_v59, %v2908_v60  ;;  %v2786_v59 = vld [vmem:[%s5200_s2 + $0x20] sm:$0xf]  ;;  %v3413_v60 = vld [vmem:[%s5200_s2 + $0x44] sm:$0xf0] }
  0x5d   : > { %985 = vmatmul.bf16.gmra.mxu3 %v3983_v34 }
  0x5f   : > { %1214 = vmatpush.bf16.msra.mxu0 %v2987_v6  ;;  %v3428_v6 = vld [vmem:[%s5200_s2 + $0xc4] sm:$0xf] }
  0x63   : > { %1215 = vmatpush.bf16.msra.mxu0 %v2947_v12  ;;  %v2826_v12 = vld [vmem:[%s5200_s2 + $0x70] sm:$0xf] }
  0x65   : > { %843 = vmatmul.bf16.gmra.mxu0 %v3990_v35 }
  0x66   : > { %892 = vmatmul.bf16.gmra.mxu1 %v3990_v35 }
  0x6c   : > { %941 = vmatmul.bf16.gmra.mxu2 %v3990_v35 }
  0x6d   : > { %990 = vmatmul.bf16.gmra.mxu3 %v3990_v35 }
  0x75   : > { %848 = vmatmul.bf16.gmra.mxu0 %v3997_v36 }
  0x76   : > { %897 = vmatmul.bf16.gmra.mxu1 %v3997_v36 }
  0x7c   : > { %946 = vmatmul.bf16.gmra.mxu2 %v3997_v36 }
  0x7d   : > { %995 = vmatmul.bf16.gmra.mxu3 %v3997_v36 }
  0x85   : > { %853 = vmatmul.bf16.gmra.mxu0 %v4052_v61 }
  0x86   : > { %902 = vmatmul.bf16.gmra.mxu1 %v4052_v61 }
  0x8c   : > { %951 = vmatmul.bf16.gmra.mxu2 %v4052_v61 }
  0x8d   : > { %1000 = vmatmul.bf16.gmra.mxu3 %v4052_v61 }
  0x95   : > { %858 = vmatmul.bf16.gmra.mxu0 %v4106_v22 }
  0x96   : > { %907 = vmatmul.bf16.gmra.mxu1 %v4106_v22 }
  0x9c   : > { %956 = vmatmul.bf16.gmra.mxu2 %v4106_v22 }
  0x9d   : > { %1005 = vmatmul.bf16.gmra.mxu3 %v4106_v22 }
  0xa5   : > { %863 = vmatmul.bf16.gmra.mxu0 %v4173_v58 }
  0xa6   : > { %912 = vmatmul.bf16.gmra.mxu1 %v4173_v58 }
  0xac   : > { %961 = vmatmul.bf16.gmra.mxu2 %v4173_v58 }
  0xad   : > { %1010 = vmatmul.bf16.gmra.mxu3 %v4173_v58 }
  0xb2   : > { %v4217_v14 = vpop.f32.mrf.mxu0 }
  0xb3   : > { %v4219_v15 = vpop.f32.mrf.mxu1 }
  0xb5   : > { %1024 = vmatmul.bf16.vlgmr.msrb.gmra.mxu0 %v3946_v18 }
  0xb6   : > { %1073 = vmatmul.bf16.vlgmr.msrb.gmra.mxu1 %v3946_v18 }
  0xba   : > { %v4223_v16 = vpop.f32.mrf.mxu0 }
  0xbb   : > { %v4225_v17 = vpop.f32.mrf.mxu1 }
  0xbc   : > { %1122 = vmatmul.bf16.vlgmr.msrb.gmra.mxu2 %v3946_v18 }
  0xbd   : > { %1171 = vmatmul.bf16.vlgmr.msrb.gmra.mxu3 %v3946_v18 }
  0xbf   : > { %v4233_v21 = vpop.f32.mrf.mxu2 }
  0xc0   : > { %5208 = vst [vmem:[#allocation5_spill] sm:$0xff] %v4233_v21  ;;  %v4235_v23 = vpop.f32.mrf.mxu3 }
  0xc1   : > { %5209 = vst [vmem:[#allocation6_spill] sm:$0xff] %v4235_v23 }
  0xc2   : > { %v4229_v19 = vpop.f32.mrf.mxu0 }
  0xc3   : > { %v4231_v20 = vpop.f32.mrf.mxu1 }
  0xc5   : > { %1029 = vmatmul.bf16.gmra.mxu0 %v3976_v33 }
  0xc6   : > { %1078 = vmatmul.bf16.gmra.mxu1 %v3976_v33 }
  0xc7   : > { %v4243_v26 = vpop.f32.mrf.mxu2 }
  0xc8   : > { %5210 = vst [vmem:[#allocation7_spill] sm:$0xff] %v4243_v26  ;;  %v4245_v27 = vpop.f32.mrf.mxu3 }
  0xc9   : > { %5211 = vst [vmem:[#allocation8_spill] sm:$0xff] %v4245_v27 }
  0xca   : > { %v4239_v24 = vpop.f32.mrf.mxu0 }
  0xcb   : > { %v4241_v25 = vpop.f32.mrf.mxu1 }
  0xcc   : > { %1127 = vmatmul.bf16.gmra.mxu2 %v3976_v33 }
  0xcd   : > { %1176 = vmatmul.bf16.gmra.mxu3 %v3976_v33 }
  0xcf   : > { %v4253_v30 = vpop.f32.mrf.mxu2 }
  0xd0   : > { %5212 = vst [vmem:[#allocation9_spill] sm:$0xff] %v4253_v30  ;;  %v4255_v31 = vpop.f32.mrf.mxu3 }
  0xd1   : > { %5213 = vst [vmem:[#allocation10_spill] sm:$0xff] %v4255_v31 }
  0xd2   : > { %v4249_v28 = vpop.f32.mrf.mxu0 }
  0xd3   : > { %v4251_v29 = vpop.f32.mrf.mxu1 }
  0xd5   : > { %1034 = vmatmul.bf16.gmra.mxu0 %v3983_v34 }
  0xd6   : > { %1083 = vmatmul.bf16.gmra.mxu1 %v3983_v34 }
  0xd7   : > { %v4263_v38 = vpop.f32.mrf.mxu2 }
  0xd8   : > { %5214 = vst [vmem:[#allocation11_spill] sm:$0xff] %v4263_v38  ;;  %v4265_v39 = vpop.f32.mrf.mxu3 }
  0xd9   : > { %5215 = vst [vmem:[#allocation12_spill] sm:$0xff] %v4265_v39 }
  0xda   : > { %v4259_v32 = vpop.f32.mrf.mxu0 }
  0xdb   : > { %v4261_v37 = vpop.f32.mrf.mxu1 }
  0xdc   : > { %1132 = vmatmul.bf16.gmra.mxu2 %v3983_v34 }
  0xdd   : > { %1181 = vmatmul.bf16.gmra.mxu3 %v3983_v34 }
  0xdf   : > { %v4273_v42 = vpop.f32.mrf.mxu2 }
  0xe0   : > { %5216 = vst [vmem:[#allocation13_spill] sm:$0xff] %v4273_v42  ;;  %v4275_v43 = vpop.f32.mrf.mxu3 }
  0xe1   : > { %5217 = vst [vmem:[#allocation14_spill] sm:$0xff] %v4275_v43 }
  0xe2   : > { %v4269_v40 = vpop.f32.mrf.mxu0 }
  0xe3   : > { %v4271_v41 = vpop.f32.mrf.mxu1 }
  0xe5   : > { %1039 = vmatmul.bf16.gmra.mxu0 %v3990_v35 }
  0xe6   : > { %1088 = vmatmul.bf16.gmra.mxu1 %v3990_v35 }
  0xe7   : > { %v4283_v46 = vpop.f32.mrf.mxu2 }
  0xe8   : > { %5218 = vst [vmem:[#allocation15_spill] sm:$0xff] %v4283_v46  ;;  %v4285_v47 = vpop.f32.mrf.mxu3 }
  0xe9   : > { %5219 = vst [vmem:[#allocation16_spill] sm:$0xff] %v4285_v47 }
  0xea   : > { %v4279_v44 = vpop.f32.mrf.mxu0 }
  0xeb   : > { %v4281_v45 = vpop.f32.mrf.mxu1 }
  0xec   : > { %1137 = vmatmul.bf16.gmra.mxu2 %v3990_v35 }
  0xed   : > { %1186 = vmatmul.bf16.gmra.mxu3 %v3990_v35  ;;  %v3478_v35 = vld [vmem:[%s5200_s2 + $0x254] sm:$0xf] }
  0xee   : > { %v3071_v55 = vor.u32 %v3478_v35, %v3068_v54 }
  0xef   : > { %v4293_v49 = vpop.f32.mrf.mxu2 }
  0xf0   : > { %5220 = vst [vmem:[#allocation17_spill] sm:$0xff] %v4293_v49  ;;  %v4301_v52 = vpop.f32.mrf.mxu3  ;;  %1261 = vmatpush.bf16.msra.mxu1 %v3071_v55  ;;  %v2906_v55 = vld [vmem:[%s5200_s2 + $0x110] sm:$0xf] }
  0xf1   : > { %5221 = vst [vmem:[#allocation18_spill] sm:$0xff] %v4301_v52 }
  0xf2   : > { %v4289_v34 = vpop.f32.mrf.mxu0 }
  0xf3   : > { %v4291_v48 = vpop.f32.mrf.mxu1 }
  0xf4   : > { %1262 = vmatpush.bf16.msra.mxu1 %v3031_v0  ;;  %v2866_v0 = vld [vmem:[%s5200_s2 + $0xc0] sm:$0xf] }
  0xf5   : > { %1044 = vmatmul.bf16.gmra.mxu0 %v3997_v36  ;;  %v2867_v4 = vor.u32 %v3433_v3, %v2866_v0  ;;  %v3408_v0 = vld [vmem:[%s5200_s2 + $0x24] sm:$0xf]  ;;  %v2788_v3 = vld [vmem:[%s5200_s2 + $0x48] sm:$0xf0] }
  0xf6   : > { %1093 = vmatmul.bf16.gmra.mxu1 %v3997_v36 }
  0xf7   : > { %v4327_v2 = vpop.f32.mrf.mxu2 }
  0xf8   : > { %v4335_v5 = vpop.f32.mrf.mxu3  ;;  %1263 = vmatpush.bf16.msra.mxu1 %v2991_v9  ;;  %v2871_v9 = vor.u32 %v3428_v6, %v2868_v7  ;;  %v2791_v6 = vor.u32 %v3408_v0, %v2788_v3 }
  0xf9   : > { %5222 = vst [vmem:[#allocation19_spill] sm:$0xff] %v4335_v5 }
  0xfa   : > { %v4323_v63 = vpop.f32.mrf.mxu0 }
  0xfb   : > { %v4325_v1 = vpop.f32.mrf.mxu1 }
  0xfc   : > { %1142 = vmatmul.bf16.gmra.mxu2 %v3997_v36  ;;  %1264 = vmatpush.bf16.msra.mxu1 %v2951_v53  ;;  %v2827_v53 = vor.u32 %v3423_v13, %v2826_v12 }
  0xfd   : > { %1191 = vmatmul.bf16.gmra.mxu3 %v3997_v36  ;;  %v2907_v36 = vor.u32 %v3443_v56, %v2906_v55  ;;  %v3418_v55 = vld [vmem:[%s5200_s2 + $0x74] sm:$0xf]  ;;  %v2828_v56 = vld [vmem:[%s5200_s2 + $0x98] sm:$0xf0] }
  0xff   : > { %v4361_v54 = vpop.f32.mrf.mxu2  ;;  %1216 = vmatpush.bf16.msra.mxu0 %v2907_v36  ;;  %v2831_v36 = vor.u32 %v3418_v55, %v2828_v56 }
 0x100   : > { %v4369_v57 = vpop.f32.mrf.mxu3  ;;  %1265 = vmatpush.bf16.msra.mxu1 %v2911_v62  ;;  %v2787_v62 = vor.u32 %v3413_v60, %v2786_v59  ;;  %v4440_v60 = vld [vmem:[%s5201_s3] sm:$0xff] }
 0x101   : > { %v4447_v0 = vperm.slane %v4440_v60, 0 }
 0x102   : > { %v4357_v51 = vpop.f32.mrf.mxu0 }
 0x103   : > { %v4359_v35 = vpop.f32.mrf.mxu1  ;;  %1217 = vmatpush.bf16.msra.mxu0 %v2867_v4 }
 0x104   : > { %1266 = vmatpush.bf16.msra.mxu1 %v2871_v9 }
 0x105   : > { %1049 = vmatmul.bf16.gmra.mxu0 %v4052_v61 }
 0x106   : > { %1098 = vmatmul.bf16.gmra.mxu1 %v4052_v61 }
 0x107   : > { %v4393_v11 = vpop.f32.mrf.mxu2  ;;  %1218 = vmatpush.bf16.msra.mxu0 %v2827_v53 }
 0x108   : > { %v4401_v50 = vpop.f32.mrf.mxu3  ;;  %1267 = vmatpush.bf16.msra.mxu1 %v2831_v36 }
 0x10a   : > { %v856_v8 = vpop.f32.mrf.mxu0 }
 0x10b   : > { %v4391_v10 = vpop.f32.mrf.mxu1  ;;  %1219 = vmatpush.bf16.msra.mxu0 %v2787_v62 }
 0x10c   : > { %1147 = vmatmul.bf16.gmra.mxu2 %v4052_v61  ;;  %1268 = vmatpush.bf16.msra.mxu1 %v2791_v6 }
 0x10d   : > { %1196 = vmatmul.bf16.gmra.mxu3 %v4052_v61 }
 0x10f   : > { %v4423_v9 = vpop.f32.mrf.mxu2 }
 0x110   : > { %v4425_v12 = vpop.f32.mrf.mxu3 }
 0x112   : > { %v859_v4 = vpop.f32.mrf.mxu0 }
 0x113   : > { %v908_v7 = vpop.f32.mrf.mxu1  ;;  %v860_v43 = vadd.f32 %v859_v4, %v4447_v0 }
 0x115   : > { %1054 = vmatmul.bf16.gmra.mxu0 %v4106_v22  ;;  %v1430_v4 = vmax.f32 %v860_v43, 0.0 }
 0x116   : > { %1103 = vmatmul.bf16.gmra.mxu1 %v4106_v22 }
 0x117   : > { %v4429_v55 = vpop.f32.mrf.mxu2 }
 0x118   : > { %v4431_v56 = vpop.f32.mrf.mxu3 }
 0x11a   : > { %v861_v13 = vpop.f32.mrf.mxu0 }
 0x11b   : > { %v910_v53 = vpop.f32.mrf.mxu1  ;;  %v862_v21 = vadd.f32 %v861_v13, %v4447_v0  ;;  %v857_v13 = vadd.f32 %v856_v8, %v4447_v0 }
 0x11c   : > { %1152 = vmatmul.bf16.gmra.mxu2 %v4106_v22 }
 0x11d   : > { %1201 = vmatmul.bf16.gmra.mxu3 %v4106_v22  ;;  %v4450_v22 = vperm.slane %v4440_v60, 1 }
 0x11f   : > { %v4435_v59 = vpop.f32.mrf.mxu2  ;;  %v911_v30 = vadd.f32 %v910_v53, %v4450_v22  ;;  %v906_v49 = vadd.f32 %v4391_v10, %v4450_v22 }
 0x120   : > { %v4442_v62 = vpop.f32.mrf.mxu3 }
 0x121   : > { %v1441_v53 = vmax.f32 %v911_v30, 0.0  ;;  %v852_v30 = vadd.f32 %v4323_v63, %v4447_v0  ;;  %v1421_v43 = vmax.f32 %v906_v49, 0.0  ;;  %v1590_v63 = vmin.f32 %v1430_v4, 6.0 }
 0x122   : > { %v864_v61 = vpop.f32.mrf.mxu0  ;;  %v847_v49 = vadd.f32 %v4279_v44, %v4447_v0 }
 0x123   : > { %v913_v36 = vpop.f32.mrf.mxu1  ;;  %v865_v3 = vadd.f32 %v864_v61, %v4447_v0 }
 0x124   : > { %v914_v6 = vadd.f32 %v913_v36, %v4450_v22  ;;  %v909_v36 = vadd.f32 %v908_v7, %v4450_v22 }
 0x125   : > { %1059 = vmatmul.bf16.gmra.mxu0 %v4173_v58  ;;  %v1450_v42 = vmax.f32 %v865_v3, 0.0 }
 0x126   : > { %1108 = vmatmul.bf16.gmra.mxu1 %v4173_v58  ;;  %v1451_v47 = vmax.f32 %v914_v6, 0.0 }
 0x127   : > { %v4456_v31 = vpop.f32.mrf.mxu2 }
 0x128   : > { %v4460_v38 = vpop.f32.mrf.mxu3  ;;  %v1611_v8 = vmin.f32 %v1451_v47, 6.0 }
 0x12a   : > { %v866_v23 = vpop.f32.mrf.mxu0 }
 0x12b   : > { %v867_v27 = vadd.f32 %v866_v23, %v4447_v0  ;;  %v915_v26 = vpop.f32.mrf.mxu1  ;;  %v1440_v23 = vmax.f32 %v862_v21, 0.0  ;;  %v1431_v21 = vmax.f32 %v909_v36, 0.0 }
 0x12c   : > { %v916_v39 = vadd.f32 %v915_v26, %v4450_v22  ;;  %1157 = vmatmul.bf16.gmra.mxu2 %v4173_v58  ;;  %v855_v26 = vadd.f32 %v4357_v51, %v4447_v0 }
 0x12d   : > { %v1460_v61 = vmax.f32 %v867_v27, 0.0  ;;  %v1610_v27 = vmin.f32 %v1450_v42, 6.0  ;;  %1206 = vmatmul.bf16.gmra.mxu3 %v4173_v58  ;;  %v1600_v10 = vmin.f32 %v1440_v23, 6.0  ;;  %v901_v58 = vadd.f32 %v4325_v1, %v4450_v22 }
 0x12e   : > { %v1461_v46 = vmax.f32 %v916_v39, 0.0  ;;  %v904_v39 = vadd.f32 %v4359_v35, %v4450_v22  ;;  %v1410_v51 = vmax.f32 %v855_v26, 0.0  ;;  %v899_v35 = vadd.f32 %v4291_v48, %v4450_v22 }
 0x12f   : > { %v1620_v52 = vmin.f32 %v1460_v61, 6.0  ;;  %v4479_v42 = vpop.f32.mrf.mxu2  ;;  %v1591_v61 = vmin.f32 %v1431_v21, 6.0  ;;  %v1400_v1 = vmax.f32 %v852_v30, 0.0  ;;  %v1581_v23 = vmin.f32 %v1421_v43, 6.0 }
 0x130   : > { %v1621_v5 = vmin.f32 %v1461_v46, 6.0  ;;  %v1420_v46 = vmax.f32 %v857_v13, 0.0  ;;  %v4483_v47 = vpop.f32.mrf.mxu3  ;;  %v1411_v6 = vmax.f32 %v904_v39, 0.0  ;;  %v1401_v13 = vmax.f32 %v901_v58, 0.0 }
 0x131   : > { %1631 = vmatpush.msra.mxu2 %v1620_v52  ;;  %v1601_v52 = vmin.f32 %v1441_v53, 6.0  ;;  %v845_v48 = vadd.f32 %v4269_v40, %v4447_v0  ;;  %v1570_v26 = vmin.f32 %v1410_v51, 6.0  ;;  %v1391_v4 = vmax.f32 %v899_v35, 0.0 }
 0x132   : > { %1651 = vmatpush.msra.mxu3 %v1621_v5  ;;  %v4473_v7 = vpop.f32.mrf.mxu0  ;;  %v850_v5 = vadd.f32 %v4289_v34, %v4447_v0  ;;  %v1580_v36 = vmin.f32 %v1420_v46, 6.0  ;;  %v896_v34 = vadd.f32 %v4281_v45, %v4450_v22  ;;  %v1571_v44 = vmin.f32 %v1411_v6, 6.0 }
 0x133   : > { %v4477_v3 = vpop.f32.mrf.mxu1  ;;  %1632 = vmatpush.msra.mxu2 %v1610_v27  ;;  %v842_v45 = vadd.f32 %v4259_v32, %v4447_v0  ;;  %v1380_v39 = vmax.f32 %v847_v49, 0.0  ;;  %v1560_v21 = vmin.f32 %v1400_v1, 6.0  ;;  %v891_v30 = vadd.f32 %v4261_v37, %v4450_v22 }
 0x134   : > { %1652 = vmatpush.msra.mxu3 %v1611_v8  ;;  %v1390_v53 = vmax.f32 %v850_v5, 0.0  ;;  %v1381_v46 = vmax.f32 %v896_v34, 0.0  ;;  %v840_v58 = vadd.f32 %v4249_v28, %v4447_v0  ;;  %v1370_v43 = vmax.f32 %v845_v48, 0.0 }
 0x135   : > { %1220 = vmatmul.bf16.vlgmr.msra.gmra.mxu0 %v3946_v18  ;;  %1633 = vmatpush.msra.mxu2 %v1600_v10  ;;  %v1561_v10 = vmin.f32 %v1401_v13, 6.0  ;;  %v889_v32 = vadd.f32 %v4251_v29, %v4450_v22  ;;  %v1551_v51 = vmin.f32 %v1391_v4, 6.0  ;;  %v1360_v37 = vmax.f32 %v842_v45, 0.0 }
 0x136   : > { %1269 = vmatmul.bf16.vlgmr.msra.gmra.mxu1 %v3946_v18  ;;  %1653 = vmatpush.msra.mxu3 %v1601_v52  ;;  %v894_v18 = vadd.f32 %v4271_v41, %v4450_v22  ;;  %v1550_v52 = vmin.f32 %v1390_v53, 6.0  ;;  %v1540_v35 = vmin.f32 %v1380_v39, 6.0  ;;  %v886_v6 = vadd.f32 %v4241_v25, %v4450_v22 }
 0x137   : > { %1634 = vmatpush.msra.mxu2 %v1590_v63  ;;  %v964_v40 = vpop.f32.mrf.mxu2  ;;  %v837_v63 = vadd.f32 %v4239_v24, %v4447_v0  ;;  %v1541_v28 = vmin.f32 %v1381_v46, 6.0  ;;  %v835_v49 = vadd.f32 %v4229_v19, %v4447_v0  ;;  %v1350_v1 = vmax.f32 %v840_v58, 0.0 }
 0x138   : > { %1654 = vmatpush.msra.mxu3 %v1591_v61  ;;  %v1013_v41 = vpop.f32.mrf.mxu3  ;;  %v1371_v5 = vmax.f32 %v894_v18, 0.0  ;;  %v1361_v61 = vmax.f32 %v891_v30, 0.0  ;;  %v1530_v29 = vmin.f32 %v1370_v43, 6.0  ;;  %v1351_v34 = vmax.f32 %v889_v32, 0.0 }
 0x139   : > { %1635 = vmatpush.msra.mxu2 %v1580_v36  ;;  %v884_v36 = vadd.f32 %v4231_v20, %v4450_v22  ;;  %v4520_v13 = vperm.slane %v4440_v60, 2  ;;  %v832_v25 = vadd.f32 %v4223_v16, %v4447_v0  ;;  %v1340_v48 = vmax.f32 %v837_v63, 0.0 }
 0x13a   : > { %1655 = vmatpush.msra.mxu3 %v1581_v23  ;;  %v4499_v27 = vpop.f32.mrf.mxu0  ;;  %v1531_v24 = vmin.f32 %v1371_v5, 6.0  ;;  %v1520_v53 = vmin.f32 %v1360_v37, 6.0  ;;  %v4527_v19 = vperm.slane %v4440_v60, 3  ;;  %v881_v18 = vadd.f32 %v4225_v17, %v4450_v22 }
 0x13b   : > { %v4503_v8 = vpop.f32.mrf.mxu1  ;;  %1636 = vmatpush.msra.mxu2 %v1570_v26  ;;  %v1341_v4 = vmax.f32 %v886_v6, 0.0  ;;  %v965_v45 = vadd.f32 %v964_v40, %v4520_v13  ;;  %v830_v16 = vadd.f32 %v4217_v14, %v4447_v0  ;;  %v1510_v30 = vmin.f32 %v1350_v1, 6.0 }
 0x13c   : > { %1656 = vmatpush.msra.mxu3 %v1571_v44  ;;  %v1521_v44 = vmin.f32 %v1361_v61, 6.0  ;;  %v1014_v46 = vadd.f32 %v1013_v41, %v4527_v19  ;;  %v879_v17 = vadd.f32 %v4219_v15, %v4450_v22  ;;  %v1511_v58 = vmin.f32 %v1351_v34, 6.0 }
 0x13d   : > { %1637 = vmatpush.msra.mxu2 %v1560_v21  ;;  %v1330_v21 = vmax.f32 %v835_v49, 0.0  ;;  %v963_v40 = vadd.f32 %v4479_v42, %v4520_v13  ;;  %v1320_v43 = vmax.f32 %v832_v25, 0.0  ;;  %v1500_v14 = vmin.f32 %v1340_v48, 6.0 }
 0x13e   : > { %1657 = vmatpush.msra.mxu3 %v1561_v10  ;;  %v1331_v10 = vmax.f32 %v884_v36, 0.0  ;;  %v1012_v0 = vadd.f32 %v4483_v47, %v4527_v19  ;;  %v1501_v32 = vmin.f32 %v1341_v4, 6.0  ;;  %v960_v15 = vadd.f32 %v4456_v31, %v4520_v13 }
 0x13f   : > { %1638 = vmatpush.msra.mxu2 %v1550_v52  ;;  %v4531_v20 = vpop.f32.mrf.mxu2  ;;  %v1321_v52 = vmax.f32 %v881_v18, 0.0  ;;  %v1462_v22 = vmax.f32 %v965_v45, 0.0  ;;  %v1310_v41 = vmax.f32 %v830_v16, 0.0  ;;  %v1490_v5 = vmin.f32 %v1330_v21, 6.0 }
 0x140   : > { %1658 = vmatpush.msra.mxu3 %v1551_v51  ;;  %5223 = vst [vmem:[#allocation20_spill] sm:$0xff] %v4531_v20  ;;  %v4536_v39 = vpop.f32.mrf.mxu3  ;;  %v1463_v42 = vmax.f32 %v1014_v46, 0.0  ;;  %v1311_v51 = vmax.f32 %v879_v17, 0.0  ;;  %v1491_v63 = vmin.f32 %v1331_v10, 6.0  ;;  %v958_v47 = vadd.f32 %v4435_v59, %v4520_v13 }
 0x141   : > { %1639 = vmatpush.msra.mxu2 %v1540_v35  ;;  %5224 = vst [vmem:[#allocation21_spill] sm:$0xff] %v4536_v39  ;;  %v1452_v35 = vmax.f32 %v963_v40, 0.0  ;;  %v1480_v6 = vmin.f32 %v1320_v43, 6.0  ;;  %v1007_v31 = vadd.f32 %v4442_v62, %v4527_v19  ;;  %v955_v1 = vadd.f32 %v4429_v55, %v4520_v13 }
 0x142   : > { %1659 = vmatpush.msra.mxu3 %v1541_v28  ;;  %v4522_v23 = vpop.f32.mrf.mxu0  ;;  %v1453_v28 = vmax.f32 %v1012_v0, 0.0  ;;  %v1622_v36 = vmin.f32 %v1462_v22, 6.0  ;;  %v1470_v59 = vmin.f32 %v1310_v41, 6.0  ;;  %v1623_v48 = vmin.f32 %v1463_v42, 6.0 }
 0x143   : > { %v4529_v26 = vpop.f32.mrf.mxu1  ;;  %1640 = vmatpush.msra.mxu2 %v1530_v29  ;;  %v1442_v29 = vmax.f32 %v960_v15, 0.0  ;;  %v1471_v62 = vmin.f32 %v1311_v51, 6.0  ;;  %v1432_v18 = vmax.f32 %v958_v47, 0.0  ;;  %v1612_v4 = vmin.f32 %v1452_v35, 6.0  ;;  %v5229_v15 = vld [vmem:[#allocation19_spill] sm:$0xff] }
 0x144   : > { %1660 = vmatpush.msra.mxu3 %v1531_v24  ;;  %v1004_v24 = vadd.f32 %v4431_v56, %v4527_v19  ;;  %v1002_v55 = vadd.f32 %v4425_v12, %v4527_v19  ;;  %v1613_v45 = vmin.f32 %v1453_v28, 6.0  ;;  %v950_v16 = vadd.f32 %v4393_v11, %v4520_v13 }
 0x145   : > { %1225 = vmatmul.bf16.gmra.mxu0 %v3976_v33  ;;  %1641 = vmatpush.msra.mxu2 %v1520_v53  ;;  %v953_v53 = vadd.f32 %v4423_v9, %v4520_v13  ;;  %v1422_v56 = vmax.f32 %v955_v1, 0.0  ;;  %v1602_v21 = vmin.f32 %v1442_v29, 6.0  ;;  %v948_v17 = vadd.f32 %v4361_v54, %v4520_v13  ;;  %v5232_v29 = vld [vmem:[#allocation15_spill] sm:$0xff] }
 0x146   : > { %1274 = vmatmul.bf16.gmra.mxu1 %v3976_v33  ;;  %1661 = vmatpush.msra.mxu3 %v1521_v44  ;;  %v1009_v33 = vadd.f32 %v4460_v38, %v4527_v19  ;;  %v1481_v38 = vmin.f32 %v1321_v52, 6.0  ;;  %v1433_v44 = vmax.f32 %v1007_v31, 0.0  ;;  %v1423_v9 = vmax.f32 %v1004_v24, 0.0 }
 0x147   : > { %1642 = vmatpush.msra.mxu2 %v1510_v30  ;;  %v4561_v49 = vpop.f32.mrf.mxu2  ;;  %v999_v30 = vadd.f32 %v4401_v50, %v4527_v19  ;;  %v1412_v12 = vmax.f32 %v953_v53, 0.0  ;;  %v997_v11 = vadd.f32 %v4369_v57, %v4527_v19  ;;  %v1413_v40 = vmax.f32 %v1002_v55, 0.0 }
 0x148   : > { %1662 = vmatpush.msra.mxu3 %v1511_v58  ;;  %5225 = vst [vmem:[#allocation22_spill] sm:$0xff] %v4561_v49  ;;  %v4565_v34 = vpop.f32.mrf.mxu3  ;;  %v1443_v25 = vmax.f32 %v1009_v33, 0.0  ;;  %v1592_v58 = vmin.f32 %v1432_v18, 6.0  ;;  %v945_v0 = vadd.f32 %v4327_v2, %v4520_v13  ;;  %v1402_v54 = vmax.f32 %v950_v16, 0.0  ;;  %v5230_v33 = vld [vmem:[#allocation17_spill] sm:$0xff]  ;;  %v5231_v2 = vld [vmem:[#allocation18_spill] sm:$0xff] }
 0x149   : > { %1643 = vmatpush.msra.mxu2 %v1500_v14  ;;  %5226 = vst [vmem:[#allocation23_spill] sm:$0xff] %v4565_v34  ;;  %v1593_v14 = vmin.f32 %v1433_v44, 6.0  ;;  %v1582_v52 = vmin.f32 %v1422_v56, 6.0  ;;  %v994_v22 = vadd.f32 %v5229_v15, %v4527_v19  ;;  %v1403_v41 = vmax.f32 %v999_v30, 0.0  ;;  %v5235_v44 = vld [vmem:[#allocation13_spill] sm:$0xff] }
 0x14a   : > { %1663 = vmatpush.msra.mxu3 %v1501_v32  ;;  %v4553_v37 = vpop.f32.mrf.mxu0  ;;  %v1603_v46 = vmin.f32 %v1443_v25, 6.0  ;;  %v1583_v57 = vmin.f32 %v1423_v9, 6.0  ;;  %v943_v42 = vadd.f32 %v5230_v33, %v4520_v13  ;;  %v1392_v51 = vmax.f32 %v948_v17, 0.0 }
 0x14b   : > { %v4557_v61 = vpop.f32.mrf.mxu1  ;;  %1644 = vmatpush.msra.mxu2 %v1490_v5  ;;  %v3608_v5 = vld [vmem:[%s3931_s17 + $0x10] sm:$0xff]  ;;  %v992_v47 = vadd.f32 %v5231_v2, %v4527_v19  ;;  %v1393_v35 = vmax.f32 %v997_v11, 0.0  ;;  %v1382_v31 = vmax.f32 %v945_v0, 0.0  ;;  %v1562_v28 = vmin.f32 %v1402_v54, 6.0  ;;  %v5239_v11 = vld [vmem:[#allocation12_spill] sm:$0xff] }
 0x14c   : > { %1664 = vmatpush.msra.mxu3 %v1491_v63  ;;  %v1572_v63 = vmin.f32 %v1412_v12, 6.0  ;;  %v1563_v1 = vmin.f32 %v1403_v41, 6.0  ;;  %v1552_v24 = vmin.f32 %v1392_v51, 6.0  ;;  %v5240_v54 = vld [vmem:[#allocation9_spill] sm:$0xff]  ;;  %v5243_v2 = vld [vmem:[#allocation8_spill] sm:$0xff] }
 0x14d   : > { %1645 = vmatpush.msra.mxu2 %v1480_v6  ;;  %v1573_v6 = vmin.f32 %v1413_v40, 6.0  ;;  %v1373_v53 = vmax.f32 %v992_v47, 0.0  ;;  %v1553_v18 = vmin.f32 %v1393_v35, 6.0  ;;  %v1542_v16 = vmin.f32 %v1382_v31, 6.0 }
 0x14e   : > { %1665 = vmatpush.msra.mxu3 %v1481_v38  ;;  %v1383_v38 = vmax.f32 %v994_v22, 0.0  ;;  %v984_v40 = vadd.f32 %v5239_v11, %v4527_v19  ;;  %v5241_v22 = vld [vmem:[#allocation10_spill] sm:$0xff]  ;;  %v979_v47 = vadd.f32 %v5243_v2, %v4527_v19 }
 0x14f   : > { %1646 = vmatpush.msra.mxu2 %v1470_v59  ;;  %v4585_v50 = vpop.f32.mrf.mxu2  ;;  %v1372_v59 = vmax.f32 %v943_v42, 0.0  ;;  %v1533_v0 = vmin.f32 %v1373_v53, 6.0  ;;  %v982_v41 = vadd.f32 %v5241_v22, %v4527_v19 }
 0x150   : > { %1666 = vmatpush.msra.mxu3 %v1471_v62  ;;  %5227 = vst [vmem:[#allocation24_spill] sm:$0xff] %v4585_v50  ;;  %v4589_v32 = vpop.f32.mrf.mxu3  ;;  %v1543_v9 = vmin.f32 %v1383_v38, 6.0  ;;  %v1343_v35 = vmax.f32 %v984_v40, 0.0  ;;  %v5245_v38 = vld [vmem:[#allocation5_spill] sm:$0xff] }
 0x151   : > { %1671 = vmatpush.msrb.mxu2 %v1622_v36  ;;  %5228 = vst [vmem:[#allocation25_spill] sm:$0xff] %v4589_v32  ;;  %v940_v36 = vadd.f32 %v5232_v29, %v4520_v13 }
 0x152   : > { %1691 = vmatpush.msrb.mxu3 %v1623_v48  ;;  %v4579_v10 = vpop.f32.mrf.mxu0  ;;  %v5233_v48 = vld [vmem:[#allocation16_spill] sm:$0xff] }
 0x153   : > { %1672 = vmatpush.msrb.mxu2 %v1612_v4  ;;  %v4583_v43 = vpop.f32.mrf.mxu1  ;;  %v989_v62 = vadd.f32 %v5233_v48, %v4527_v19  ;;  %v1362_v12 = vmax.f32 %v940_v36, 0.0 }
 0x154   : > { %1692 = vmatpush.msrb.mxu3 %v1613_v45  ;;  %v938_v45 = vadd.f32 %v5235_v44, %v4520_v13 }
 0x155   : > { %1673 = vmatpush.msrb.mxu2 %v1602_v21  ;;  %1230 = vmatmul.bf16.gmra.mxu0 %v3608_v5  ;;  %v5237_v21 = vld [vmem:[#allocation14_spill] sm:$0xff]  ;;  %v1522_v51 = vmin.f32 %v1362_v12, 6.0 }
 0x156   : > { %1693 = vmatpush.msrb.mxu3 %v1603_v46  ;;  %1279 = vmatmul.bf16.gmra.mxu1 %v3608_v5  ;;  %v987_v30 = vadd.f32 %v5237_v21, %v4527_v19  ;;  %v5238_v46 = vld [vmem:[#allocation11_spill] sm:$0xff]  ;;  %v1352_v15 = vmax.f32 %v938_v45, 0.0  ;;  %v1503_v21 = vmin.f32 %v1343_v35, 6.0 }
 0x157   : > { %1674 = vmatpush.msrb.mxu2 %v1592_v58  ;;  %v4606_v55 = vpop.f32.mrf.mxu2  ;;  %v935_v17 = vadd.f32 %v5238_v46, %v4520_v13  ;;  %v1532_v58 = vmin.f32 %v1372_v59, 6.0  ;;  %v5242_v5 = vld [vmem:[#allocation7_spill] sm:$0xff] }
 0x158   : > { %1694 = vmatpush.msrb.mxu3 %v1593_v14  ;;  %5234 = vst [vmem:[#allocation19_spill] sm:$0xff] %v4606_v55  ;;  %v4610_v56 = vpop.f32.mrf.mxu3  ;;  %v1363_v14 = vmax.f32 %v989_v62, 0.0  ;;  %v930_v33 = vadd.f32 %v5242_v5, %v4520_v13  ;;  %v1512_v36 = vmin.f32 %v1352_v15, 6.0  ;;  %v1333_v62 = vmax.f32 %v982_v41, 0.0  ;;  %v3610_v41 = vld [vmem:[%s3931_s17 + $0x20] sm:$0xff] }
 0x159   : > { %1675 = vmatpush.msrb.mxu2 %v1582_v52  ;;  %5236 = vst [vmem:[#allocation17_spill] sm:$0xff] %v4610_v56  ;;  %v933_v52 = vadd.f32 %v5240_v54, %v4520_v13  ;;  %v1342_v42 = vmax.f32 %v935_v17, 0.0 }
 0x15a   : > { %1695 = vmatpush.msrb.mxu3 %v1583_v57  ;;  %v4600_v25 = vpop.f32.mrf.mxu0  ;;  %v1353_v57 = vmax.f32 %v987_v30, 0.0  ;;  %v1322_v44 = vmax.f32 %v930_v33, 0.0  ;;  %v1493_v46 = vmin.f32 %v1333_v62, 6.0 }
 0x15b   : > { %1676 = vmatpush.msrb.mxu2 %v1572_v63  ;;  %v4604_v4 = vpop.f32.mrf.mxu1  ;;  %v1332_v29 = vmax.f32 %v933_v52, 0.0  ;;  %v1502_v45 = vmin.f32 %v1342_v42, 6.0 }
 0x15c   : > { %1696 = vmatpush.msrb.mxu3 %v1573_v6  ;;  %v1523_v6 = vmin.f32 %v1363_v14, 6.0  ;;  %v1513_v53 = vmin.f32 %v1353_v57, 6.0  ;;  %v1482_v17 = vmin.f32 %v1322_v44, 6.0  ;;  %v3612_v44 = vld [vmem:[%s3931_s17 + $0x30] sm:$0xff] }
 0x15d   : > { %1677 = vmatpush.msrb.mxu2 %v1562_v28  ;;  %v1492_v30 = vmin.f32 %v1332_v29, 6.0 }
 0x15e   : > { %1697 = vmatpush.msrb.mxu3 %v1563_v1  ;;  %v928_v1 = vadd.f32 %v5245_v38, %v4520_v13 }
 0x15f   : > { %1678 = vmatpush.msrb.mxu2 %v1552_v24  ;;  %v4630_v28 = vpop.f32.mrf.mxu2  ;;  %v5247_v24 = vld [vmem:[#allocation6_spill] sm:$0xff] }
 0x160   : > { %1698 = vmatpush.msrb.mxu3 %v1553_v18  ;;  %5244 = vst [vmem:[#allocation18_spill] sm:$0xff] %v4630_v28  ;;  %v4634_v59 = vpop.f32.mrf.mxu3  ;;  %v977_v48 = vadd.f32 %v5247_v24, %v4527_v19  ;;  %v3609_v18 = vld [vmem:[%s3931_s17 + $0x18] sm:$0xff]  ;;  %v1312_v13 = vmax.f32 %v928_v1, 0.0  ;;  %v4676_v24 = vld [vmem:[%s5199_s1] sm:$0xff] }
 0x161   : > { %1679 = vmatpush.msrb.mxu2 %v1542_v16  ;;  %5246 = vst [vmem:[#allocation15_spill] sm:$0xff] %v4634_v59  ;;  %v1323_v16 = vmax.f32 %v979_v47, 0.0  ;;  %1667 = vmatmul.f32.vlgmr.msra.gmra.mxu3 %v4676_v24 }
 0x162   : > { %1699 = vmatpush.msrb.mxu3 %v1543_v9  ;;  %v4624_v63 = vpop.f32.mrf.mxu0  ;;  %v1313_v9 = vmax.f32 %v977_v48, 0.0  ;;  %v1472_v40 = vmin.f32 %v1312_v13, 6.0  ;;  %1647 = vmatmul.f32.vlgmr.msra.gmra.mxu2 %v4676_v24 }
 0x163   : > { %1680 = vmatpush.msrb.mxu2 %v1532_v58  ;;  %v4628_v31 = vpop.f32.mrf.mxu1  ;;  %v1483_v12 = vmin.f32 %v1323_v16, 6.0 }
 0x164   : > { %1700 = vmatpush.msrb.mxu3 %v1533_v0  ;;  %v1473_v0 = vmin.f32 %v1313_v9, 6.0 }
 0x165   : > { %1681 = vmatpush.msrb.mxu2 %v1522_v51  ;;  %1235 = vmatmul.bf16.gmra.mxu0 %v3609_v18 }
 0x166   : > { %1701 = vmatpush.msrb.mxu3 %v1523_v6  ;;  %1284 = vmatmul.bf16.gmra.mxu1 %v3609_v18  ;;  %v3611_v6 = vld [vmem:[%s3931_s17 + $0x28] sm:$0xff] }
 0x167   : > { %1682 = vmatpush.msrb.mxu2 %v1512_v36  ;;  %v4643_v11 = vpop.f32.mrf.mxu2 }
 0x168   : > { %1702 = vmatpush.msrb.mxu3 %v1513_v53  ;;  %5248 = vst [vmem:[#allocation16_spill] sm:$0xff] %v4643_v11  ;;  %v4645_v14 = vpop.f32.mrf.mxu3 }
 0x169   : > { %1683 = vmatpush.msrb.mxu2 %v1502_v45  ;;  %5249 = vst [vmem:[#allocation13_spill] sm:$0xff] %v4645_v14 }
 0x16a   : > { %1703 = vmatpush.msrb.mxu3 %v1503_v21  ;;  %v4639_v19 = vpop.f32.mrf.mxu0 }
 0x16b   : > { %1684 = vmatpush.msrb.mxu2 %v1492_v30  ;;  %v4641_v58 = vpop.f32.mrf.mxu1 }
 0x16c   : > { %1704 = vmatpush.msrb.mxu3 %v1493_v46 }
 0x16d   : > { %1685 = vmatpush.msrb.mxu2 %v1482_v17 }
 0x16e   : > { %1705 = vmatpush.msrb.mxu3 %v1483_v12  ;;  %v3613_v12 = vld [vmem:[%s3931_s17 + $0x38] sm:$0xff]  ;;  %s2717_s17 = sshll.u32 %s243_s12, 3 }
 0x16f   : > { %1686 = vmatpush.msrb.mxu2 %v1472_v40  ;;  %v4651_v15 = vpop.f32.mrf.mxu2  ;;  %v4697_v40 = vperm.slane %v4440_v60, 4  ;;  %s245_s18 = scalar_lea.vmem [#allocation2], %s2717_s17 }
 0x170   : > { %1706 = vmatpush.msrb.mxu3 %v1473_v0  ;;  %v4653_v22 = vpop.f32.mrf.mxu3  ;;  %1687 = vmatmul.f32.vlgmr.msrb.gmra.mxu2 %v4676_v24  ;;  %v4700_v0 = vperm.slane %v4440_v60, 5  ;;  %s2651_s19 = sshll.u32 %s245_s18, 4  ;;  %s2652_s19 = int_to_ptr.vmem [resolvable:$true] %s2651_s19 }
 0x171   : > { %5250 = vst [vmem:[#allocation14_spill] sm:$0xff] %v4653_v22  ;;  %1707 = vmatmul.f32.vlgmr.msrb.gmra.mxu3 %v4676_v24 }
 0x172   : > { %v4647_v54 = vpop.f32.mrf.mxu0 }
 0x173   : > { %v4649_v52 = vpop.f32.mrf.mxu1 }
 0x175   : > { %1240 = vmatmul.bf16.gmra.mxu0 %v3610_v41 }
 0x176   : > { %1289 = vmatmul.bf16.gmra.mxu1 %v3610_v41 }
 0x177   : > { %v4660_v33 = vpop.f32.mrf.mxu2 }
 0x178   : > { %v4662_v42 = vpop.f32.mrf.mxu3 }
 0x17a   : > { %v4656_v57 = vpop.f32.mrf.mxu0 }
 0x17b   : > { %v4658_v5 = vpop.f32.mrf.mxu1 }
 0x17f   : > { %v4664_v47 = vpop.f32.mrf.mxu2 }
 0x180   : > { %v4666_v35 = vpop.f32.mrf.mxu3 }
 0x182   : > { %v1050_v51 = vpop.f32.mrf.mxu0 }
 0x183   : > { %v1099_v2 = vpop.f32.mrf.mxu1 }
 0x184   : > { %v1100_v22 = vadd.f32 %v1099_v2, %v4700_v0 }
 0x185   : > { %1245 = vmatmul.bf16.gmra.mxu0 %v3611_v6 }
 0x186   : > { %1294 = vmatmul.bf16.gmra.mxu1 %v3611_v6  ;;  %v1415_v2 = vmax.f32 %v1100_v22, 0.0 }
 0x187   : > { %v4669_v29 = vpop.f32.mrf.mxu2 }
 0x188   : > { %v4671_v36 = vpop.f32.mrf.mxu3 }
 0x18a   : > { %v1052_v38 = vpop.f32.mrf.mxu0 }
 0x18b   : > { %v1101_v1 = vpop.f32.mrf.mxu1 }
 0x18f   : > { %v4680_v53 = vpop.f32.mrf.mxu2 }
 0x190   : > { %v4682_v18 = vpop.f32.mrf.mxu3 }
 0x192   : > { %v1055_v48 = vpop.f32.mrf.mxu0 }
 0x193   : > { %v1104_v62 = vpop.f32.mrf.mxu1  ;;  %v1056_v32 = vadd.f32 %v1055_v48, %v4697_v40  ;;  %v1051_v48 = vadd.f32 %v1050_v51, %v4697_v40 }
 0x195   : > { %1250 = vmatmul.bf16.gmra.mxu0 %v3612_v44 }
 0x196   : > { %1299 = vmatmul.bf16.gmra.mxu1 %v3612_v44 }
 0x197   : > { %v4687_v21 = vpop.f32.mrf.mxu2 }
 0x198   : > { %v4689_v13 = vpop.f32.mrf.mxu3 }
 0x19a   : > { %v1057_v45 = vpop.f32.mrf.mxu0 }
 0x19b   : > { %v1106_v16 = vpop.f32.mrf.mxu1  ;;  %v1058_v39 = vadd.f32 %v1057_v45, %v4697_v40  ;;  %v1053_v45 = vadd.f32 %v1052_v38, %v4697_v40 }
 0x19c   : > { %v1107_v49 = vadd.f32 %v1106_v16, %v4700_v0  ;;  %v1102_v16 = vadd.f32 %v1101_v1, %v4700_v0 }
 0x19e   : > { %v1445_v11 = vmax.f32 %v1107_v49, 0.0  ;;  %v1097_v49 = vadd.f32 %v4658_v5, %v4700_v0 }
 0x19f   : > { %v4691_v46 = vpop.f32.mrf.mxu2 }
 0x1a0   : > { %v4693_v17 = vpop.f32.mrf.mxu3 }
 0x1a2   : > { %v1060_v30 = vpop.f32.mrf.mxu0 }
 0x1a3   : > { %v1109_v9 = vpop.f32.mrf.mxu1  ;;  %v1061_v41 = vadd.f32 %v1060_v30, %v4697_v40  ;;  %v1105_v30 = vadd.f32 %v1104_v62, %v4700_v0 }
 0x1a4   : > { %v1110_v6 = vadd.f32 %v1109_v9, %v4700_v0 }
 0x1a5   : > { %1255 = vmatmul.bf16.gmra.mxu0 %v3613_v12  ;;  %v1454_v50 = vmax.f32 %v1061_v41, 0.0  ;;  %v1434_v41 = vmax.f32 %v1056_v32, 0.0  ;;  %v1435_v62 = vmax.f32 %v1105_v30, 0.0  ;;  %v1605_v32 = vmin.f32 %v1445_v11, 6.0 }
 0x1a6   : > { %1304 = vmatmul.bf16.gmra.mxu1 %v3613_v12  ;;  %v1455_v59 = vmax.f32 %v1110_v6, 0.0 }
 0x1a7   : > { %v4709_v55 = vpop.f32.mrf.mxu2  ;;  %v1594_v51 = vmin.f32 %v1434_v41, 6.0  ;;  %v1595_v30 = vmin.f32 %v1435_v62, 6.0 }
 0x1a8   : > { %v4712_v28 = vpop.f32.mrf.mxu3  ;;  %v1615_v6 = vmin.f32 %v1455_v59, 6.0  ;;  %v1046_v59 = vadd.f32 %v4647_v54, %v4697_v40  ;;  %v1092_v54 = vadd.f32 %v4641_v58, %v4700_v0  ;;  %v1038_v58 = vadd.f32 %v4600_v25, %v4697_v40 }
 0x1a9   : > { %v1085_v25 = vadd.f32 %v4583_v43, %v4700_v0 }
 0x1aa   : > { %v1062_v44 = vpop.f32.mrf.mxu0  ;;  %v1394_v22 = vmax.f32 %v1046_v59, 0.0 }
 0x1ab   : > { %v1063_v20 = vadd.f32 %v1062_v44, %v4697_v40  ;;  %v1111_v34 = vpop.f32.mrf.mxu1  ;;  %v1444_v44 = vmax.f32 %v1058_v39, 0.0  ;;  %v1048_v39 = vadd.f32 %v4656_v57, %v4697_v40  ;;  %v1095_v57 = vadd.f32 %v4649_v52, %v4700_v0 }
 0x1ac   : > { %v1112_v12 = vadd.f32 %v1111_v34, %v4700_v0  ;;  %v1041_v52 = vadd.f32 %v4624_v63, %v4697_v40  ;;  %v1087_v63 = vadd.f32 %v4604_v4, %v4700_v0 }
 0x1ad   : > { %v1464_v56 = vmax.f32 %v1063_v20, 0.0  ;;  %v1614_v20 = vmin.f32 %v1454_v50, 6.0  ;;  %v1604_v38 = vmin.f32 %v1444_v44, 6.0  ;;  %v1425_v50 = vmax.f32 %v1102_v16, 0.0 }
 0x1ae   : > { %v1465_v9 = vmax.f32 %v1112_v12, 0.0  ;;  %v1405_v44 = vmax.f32 %v1097_v49, 0.0  ;;  %v1395_v41 = vmax.f32 %v1095_v57, 0.0  ;;  %v1364_v57 = vmax.f32 %v1038_v58, 0.0 }
 0x1af   : > { %v1624_v14 = vmin.f32 %v1464_v56, 6.0  ;;  %v1424_v56 = vmax.f32 %v1053_v45, 0.0  ;;  %v1404_v45 = vmax.f32 %v1048_v39, 0.0  ;;  %v4732_v11 = vpop.f32.mrf.mxu2  ;;  %v1585_v16 = vmin.f32 %v1425_v50, 6.0 }
 0x1b0   : > { %v1625_v34 = vmin.f32 %v1465_v9, 6.0  ;;  %v1043_v9 = vadd.f32 %v4639_v19, %v4697_v40  ;;  %v1090_v19 = vadd.f32 %v4628_v31, %v4700_v0  ;;  %v1565_v49 = vmin.f32 %v1405_v44, 6.0 }
 0x1b1   : > { %1711 = vmatpush.msra.mxu2 %v1624_v14  ;;  %v1414_v14 = vmax.f32 %v1051_v48, 0.0  ;;  %v1584_v5 = vmin.f32 %v1424_v56, 6.0  ;;  %v1564_v39 = vmin.f32 %v1404_v45, 6.0  ;;  %v1036_v31 = vadd.f32 %v4579_v10, %v4697_v40 }
 0x1b2   : > { %1731 = vmatpush.msra.mxu3 %v1625_v34  ;;  %v4718_v12 = vpop.f32.mrf.mxu0  ;;  %v4736_v34 = vpop.f32.mrf.mxu3  ;;  %v1374_v50 = vmax.f32 %v1041_v52, 0.0  ;;  %v1375_v59 = vmax.f32 %v1090_v19, 0.0  ;;  %v4770_v19 = vperm.slane %v4440_v60, 7 }
 0x1b3   : > { %v4722_v1 = vpop.f32.mrf.mxu1  ;;  %1712 = vmatpush.msra.mxu2 %v1614_v20  ;;  %v1574_v48 = vmin.f32 %v1414_v14, 6.0  ;;  %v1575_v20 = vmin.f32 %v1415_v2, 6.0  ;;  %v1555_v14 = vmin.f32 %v1395_v41, 6.0  ;;  %v1082_v2 = vadd.f32 %v4557_v61, %v4700_v0 }
 0x1b4   : > { %1732 = vmatpush.msra.mxu3 %v1615_v6  ;;  %v1384_v6 = vmax.f32 %v1043_v9, 0.0  ;;  %v1031_v9 = vadd.f32 %v4522_v23, %v4697_v40  ;;  %v1354_v45 = vmax.f32 %v1036_v31, 0.0  ;;  %v1534_v43 = vmin.f32 %v1374_v50, 6.0 }
 0x1b5   : > { %1713 = vmatpush.msra.mxu2 %v1604_v38  ;;  %v1385_v38 = vmax.f32 %v1092_v54, 0.0  ;;  %v1080_v54 = vadd.f32 %v4529_v26, %v4700_v0  ;;  %v1535_v44 = vmin.f32 %v1375_v59, 6.0  ;;  %v1077_v26 = vadd.f32 %v4503_v8, %v4700_v0 }
 0x1b6   : > { %1733 = vmatpush.msra.mxu3 %v1605_v32  ;;  %v1554_v32 = vmin.f32 %v1394_v22, 6.0  ;;  %v1544_v4 = vmin.f32 %v1384_v6, 6.0  ;;  %v1028_v22 = vadd.f32 %v4499_v27, %v4697_v40  ;;  %v1334_v27 = vmax.f32 %v1031_v9, 0.0 }
 0x1b7   : > { %1714 = vmatpush.msra.mxu2 %v1594_v51  ;;  %v1033_v51 = vadd.f32 %v4553_v37, %v4697_v40  ;;  %v1545_v10 = vmin.f32 %v1385_v38, 6.0  ;;  %v1355_v37 = vmax.f32 %v1085_v25, 0.0  ;;  %v1075_v38 = vadd.f32 %v4477_v3, %v4700_v0 }
 0x1b8   : > { %1734 = vmatpush.msra.mxu3 %v1595_v30  ;;  %v1365_v30 = vmax.f32 %v1087_v63, 0.0  ;;  %v1514_v63 = vmin.f32 %v1354_v45, 6.0  ;;  %v1324_v50 = vmax.f32 %v1028_v22, 0.0  ;;  %v1494_v0 = vmin.f32 %v1334_v27, 6.0 }
 0x1b9   : > { %1715 = vmatpush.msra.mxu2 %v1584_v5  ;;  %v1160_v5 = vpop.f32.mrf.mxu2  ;;  %v1344_v23 = vmax.f32 %v1033_v51, 0.0  ;;  %v1515_v31 = vmin.f32 %v1355_v37, 6.0  ;;  %v1205_v51 = vadd.f32 %v4712_v28, %v4770_v19 }
 0x1ba   : > { %1735 = vmatpush.msra.mxu3 %v1585_v16  ;;  %v4742_v62 = vpop.f32.mrf.mxu0  ;;  %v4763_v16 = vperm.slane %v4440_v60, 6  ;;  %v1209_v52 = vpop.f32.mrf.mxu3  ;;  %v1525_v58 = vmin.f32 %v1365_v30, 6.0 }
 0x1bb   : > { %v4746_v56 = vpop.f32.mrf.mxu1  ;;  %1716 = vmatpush.msra.mxu2 %v1574_v48  ;;  %v1524_v48 = vmin.f32 %v1364_v57, 6.0  ;;  %v1210_v60 = vadd.f32 %v1209_v52, %v4770_v19  ;;  %v1315_v57 = vmax.f32 %v1075_v38, 0.0 }
 0x1bc   : > { %1736 = vmatpush.msra.mxu3 %v1575_v20  ;;  %v1345_v20 = vmax.f32 %v1082_v2, 0.0  ;;  %v1161_v6 = vadd.f32 %v1160_v5, %v4763_v16  ;;  %v1159_v8 = vadd.f32 %v4732_v11, %v4763_v16  ;;  %v1156_v59 = vadd.f32 %v4709_v55, %v4763_v16 }
 0x1bd   : > { %1717 = vmatpush.msra.mxu2 %v1564_v39  ;;  %v1026_v39 = vadd.f32 %v4473_v7, %v4697_v40  ;;  %v1208_v7 = vadd.f32 %v4736_v34, %v4770_v19  ;;  %v1325_v40 = vmax.f32 %v1077_v26, 0.0  ;;  %v1467_v11 = vmax.f32 %v1210_v60, 0.0 }
 0x1be   : > { %1737 = vmatpush.msra.mxu3 %v1565_v49  ;;  %v1335_v49 = vmax.f32 %v1080_v54, 0.0  ;;  %v1505_v25 = vmin.f32 %v1345_v20, 6.0  ;;  %v1154_v34 = vadd.f32 %v4691_v46, %v4763_v16  ;;  %v1456_v30 = vmax.f32 %v1159_v8, 0.0 }
 0x1bf   : > { %1718 = vmatpush.msra.mxu2 %v1554_v32  ;;  %v1504_v32 = vmin.f32 %v1344_v23, 6.0  ;;  %v1314_v3 = vmax.f32 %v1026_v39, 0.0  ;;  %v1203_v55 = vadd.f32 %v4693_v17, %v4770_v19  ;;  %v1457_v45 = vmax.f32 %v1208_v7, 0.0 }
 0x1c0   : > { %1738 = vmatpush.msra.mxu3 %v1555_v14  ;;  %v1466_v14 = vmax.f32 %v1161_v6, 0.0  ;;  %v1151_v28 = vadd.f32 %v4687_v21, %v4763_v16  ;;  %v1446_v5 = vmax.f32 %v1156_v59, 0.0  ;;  %v1200_v46 = vadd.f32 %v4689_v13, %v4770_v19 }
 0x1c1   : > { %1719 = vmatpush.msra.mxu2 %v1544_v4  ;;  %v1495_v4 = vmin.f32 %v1335_v49, 6.0  ;;  %v1474_v37 = vmin.f32 %v1314_v3, 6.0  ;;  %v1627_v52 = vmin.f32 %v1467_v11, 6.0  ;;  %v1475_v22 = vmin.f32 %v1315_v57, 6.0 }
 0x1c2   : > { %1739 = vmatpush.msra.mxu3 %v1545_v10  ;;  %v4765_v61 = vpop.f32.mrf.mxu0  ;;  %v1484_v10 = vmin.f32 %v1324_v50, 6.0  ;;  %v1626_v54 = vmin.f32 %v1466_v14, 6.0  ;;  %v1149_v23 = vadd.f32 %v4680_v53, %v4763_v16  ;;  %v1436_v17 = vmax.f32 %v1154_v34, 0.0  ;;  %v5251_v14 = vld [vmem:[#allocation14_spill] sm:$0xff] }
 0x1c3   : > { %v4772_v41 = vpop.f32.mrf.mxu1  ;;  %1720 = vmatpush.msra.mxu2 %v1534_v43  ;;  %v1485_v43 = vmin.f32 %v1325_v40, 6.0  ;;  %v1198_v26 = vadd.f32 %v4682_v18, %v4770_v19  ;;  %v1437_v21 = vmax.f32 %v1203_v55, 0.0  ;;  %v1617_v20 = vmin.f32 %v1457_v45, 6.0  ;;  %v5253_v55 = vld [vmem:[#allocation13_spill] sm:$0xff] }
 0x1c4   : > { %1740 = vmatpush.msra.mxu3 %v1535_v44  ;;  %v1447_v44 = vmax.f32 %v1205_v51, 0.0  ;;  %v1426_v13 = vmax.f32 %v1151_v28, 0.0  ;;  %v1606_v6 = vmin.f32 %v1446_v5, 6.0  ;;  %v1195_v39 = vadd.f32 %v4671_v36, %v4770_v19 }
 0x1c5   : > { %1721 = vmatpush.msra.mxu2 %v1524_v48  ;;  %v1616_v48 = vmin.f32 %v1456_v30, 6.0  ;;  %v1427_v53 = vmax.f32 %v1200_v46, 0.0  ;;  %v1144_v18 = vadd.f32 %v4664_v47, %v4763_v16  ;;  %v1596_v38 = vmin.f32 %v1436_v17, 6.0 }
 0x1c6   : > { %1741 = vmatpush.msra.mxu3 %v1525_v58  ;;  %v1146_v58 = vadd.f32 %v4669_v29, %v4763_v16  ;;  %v1607_v27 = vmin.f32 %v1447_v44, 6.0  ;;  %v1193_v29 = vadd.f32 %v4666_v35, %v4770_v19  ;;  %v1417_v49 = vmax.f32 %v1198_v26, 0.0  ;;  %v5255_v44 = vld [vmem:[#allocation15_spill] sm:$0xff] }
 0x1c7   : > { %1722 = vmatpush.msra.mxu2 %v1514_v63  ;;  %v1416_v63 = vmax.f32 %v1149_v23, 0.0  ;;  %v1141_v8 = vadd.f32 %v4660_v33, %v4763_v16  ;;  %v1586_v47 = vmin.f32 %v1426_v13, 6.0  ;;  %v1407_v7 = vmax.f32 %v1195_v39, 0.0  ;;  %v5256_v23 = vld [vmem:[#allocation19_spill] sm:$0xff] }
 0x1c8   : > { %1742 = vmatpush.msra.mxu3 %v1515_v31  ;;  %v1597_v31 = vmin.f32 %v1437_v21, 6.0  ;;  %v1406_v50 = vmax.f32 %v1146_v58, 0.0  ;;  %v1587_v40 = vmin.f32 %v1427_v53, 6.0  ;;  %v1139_v35 = vadd.f32 %v4651_v15, %v4763_v16  ;;  %v5257_v21 = vld [vmem:[#allocation17_spill] sm:$0xff] }
 0x1c9   : > { %1723 = vmatpush.msra.mxu2 %v1504_v32  ;;  %v1190_v32 = vadd.f32 %v4662_v42, %v4770_v19  ;;  %v1576_v59 = vmin.f32 %v1416_v63, 6.0  ;;  %v1188_v3 = vadd.f32 %v5251_v14, %v4770_v19  ;;  %v1577_v33 = vmin.f32 %v1417_v49, 6.0 }
 0x1ca   : > { %1743 = vmatpush.msra.mxu3 %v1505_v25  ;;  %v4790_v2 = vpop.f32.mrf.mxu0  ;;  %v1396_v25 = vmax.f32 %v1144_v18, 0.0  ;;  %v1386_v51 = vmax.f32 %v1141_v8, 0.0  ;;  %v1566_v11 = vmin.f32 %v1406_v50, 6.0  ;;  %v1567_v42 = vmin.f32 %v1407_v7, 6.0  ;;  %v5261_v50 = vld [vmem:[#allocation23_spill] sm:$0xff] }
 0x1cb   : > { %v4794_v9 = vpop.f32.mrf.mxu1  ;;  %1724 = vmatpush.msra.mxu2 %v1494_v0  ;;  %v1397_v0 = vmax.f32 %v1193_v29, 0.0  ;;  %v1387_v57 = vmax.f32 %v1190_v32, 0.0  ;;  %v1376_v30 = vmax.f32 %v1139_v35, 0.0  ;;  %v1185_v45 = vadd.f32 %v5253_v55, %v4770_v19  ;;  %v5262_v35 = vld [vmem:[#allocation20_spill] sm:$0xff] }
 0x1cc   : > { %1744 = vmatpush.msra.mxu3 %v1495_v4  ;;  %v5252_v4 = vld [vmem:[#allocation16_spill] sm:$0xff]  ;;  %v1556_v15 = vmin.f32 %v1396_v25, 6.0  ;;  %v1546_v46 = vmin.f32 %v1386_v51, 6.0  ;;  %v1131_v17 = vadd.f32 %v5256_v23, %v4763_v16  ;;  %v1124_v25 = vadd.f32 %v5262_v35, %v4763_v16 }
 0x1cd   : > { %1725 = vmatpush.msra.mxu2 %v1484_v10  ;;  %v1136_v34 = vadd.f32 %v5252_v4, %v4763_v16  ;;  %v1557_v28 = vmin.f32 %v1397_v0, 6.0  ;;  %v1536_v26 = vmin.f32 %v1376_v30, 6.0  ;;  %v1367_v58 = vmax.f32 %v1185_v45, 0.0 }
 0x1ce   : > { %1745 = vmatpush.msra.mxu3 %v1485_v43  ;;  %v1377_v43 = vmax.f32 %v1188_v3, 0.0  ;;  %v1346_v49 = vmax.f32 %v1131_v17, 0.0  ;;  %v5263_v3 = vld [vmem:[#allocation21_spill] sm:$0xff] }
 0x1cf   : > { %1726 = vmatpush.msra.mxu2 %v1474_v37  ;;  %v1527_v7 = vmin.f32 %v1367_v58, 6.0  ;;  %v1173_v0 = vadd.f32 %v5263_v3, %v4770_v19 }
 0x1d0   : > { %1746 = vmatpush.msra.mxu3 %v1475_v22  ;;  %1727 = vmatmul.f32.vlgmr.msra.gmra.mxu2 %v4676_v24  ;;  %v1547_v22 = vmin.f32 %v1387_v57, 6.0  ;;  %v1537_v13 = vmin.f32 %v1377_v43, 6.0  ;;  %v1506_v57 = vmin.f32 %v1346_v49, 6.0 }
 0x1d1   : > { %1751 = vmatpush.msrb.mxu2 %v1626_v54  ;;  %1747 = vmatmul.f32.vlgmr.msra.gmra.mxu3 %v4676_v24  ;;  %v5254_v54 = vld [vmem:[#allocation18_spill] sm:$0xff] }
 0x1d2   : > { %1771 = vmatpush.msrb.mxu3 %v1627_v52  ;;  %v4813_v60 = vpop.f32.mrf.mxu0  ;;  %v1134_v37 = vadd.f32 %v5254_v54, %v4763_v16  ;;  %v1183_v52 = vadd.f32 %v5255_v44, %v4770_v19 }
 0x1d3   : > { %1752 = vmatpush.msrb.mxu2 %v1616_v48  ;;  %v4818_v36 = vpop.f32.mrf.mxu1  ;;  %v1366_v48 = vmax.f32 %v1136_v34, 0.0  ;;  %v1316_v34 = vmax.f32 %v1124_v25, 0.0 }
 0x1d4   : > { %1772 = vmatpush.msrb.mxu3 %v1617_v20  ;;  %v1180_v20 = vadd.f32 %v5257_v21, %v4770_v19  ;;  %v1356_v53 = vmax.f32 %v1134_v37, 0.0  ;;  %v1357_v63 = vmax.f32 %v1183_v52, 0.0 }
 0x1d5   : > { %1753 = vmatpush.msrb.mxu2 %v1606_v6  ;;  %v5258_v6 = vld [vmem:[#allocation24_spill] sm:$0xff] }
 0x1d6   : > { %1773 = vmatpush.msrb.mxu3 %v1607_v27  ;;  %v1129_v39 = vadd.f32 %v5258_v6, %v4763_v16  ;;  %v5259_v27 = vld [vmem:[#allocation25_spill] sm:$0xff]  ;;  %v1347_v32 = vmax.f32 %v1180_v20, 0.0  ;;  %v1516_v14 = vmin.f32 %v1356_v53, 6.0  ;;  %v1517_v51 = vmin.f32 %v1357_v63, 6.0 }
 0x1d7   : > { %1754 = vmatpush.msrb.mxu2 %v1596_v38  ;;  %v1178_v18 = vadd.f32 %v5259_v27, %v4770_v19  ;;  %v5260_v38 = vld [vmem:[#allocation22_spill] sm:$0xff] }
 0x1d8   : > { %1774 = vmatpush.msrb.mxu3 %v1597_v31  ;;  %v1126_v29 = vadd.f32 %v5260_v38, %v4763_v16  ;;  %v1526_v31 = vmin.f32 %v1366_v48, 6.0  ;;  %v1507_v4 = vmin.f32 %v1347_v32, 6.0 }
 0x1d9   : > { %1755 = vmatpush.msrb.mxu2 %v1586_v47  ;;  %v1175_v47 = vadd.f32 %v5261_v50, %v4770_v19 }
 0x1da   : > { %1775 = vmatpush.msrb.mxu3 %v1587_v40  ;;  %v4830_v10 = vpop.f32.mrf.mxu0 }
 0x1db   : > { %1756 = vmatpush.msrb.mxu2 %v1576_v59  ;;  %v4834_v5 = vpop.f32.mrf.mxu1  ;;  %v1336_v59 = vmax.f32 %v1129_v39, 0.0  ;;  %v349_v39 = vld [vmem:[%s5201_s3 + $0x8] sm:$0x3] }
 0x1dc   : > { %1776 = vmatpush.msrb.mxu3 %v1577_v33  ;;  %v1337_v33 = vmax.f32 %v1178_v18, 0.0  ;;  %v4869_v53 = vperm.slane %v349_v39, 0  ;;  %v4871_v27 = vperm.slane %v349_v39, 1 }
 0x1dd   : > { %1757 = vmatpush.msrb.mxu2 %v1566_v11  ;;  %v1326_v11 = vmax.f32 %v1126_v29, 0.0  ;;  %v1496_v30 = vmin.f32 %v1336_v59, 6.0 }
 0x1de   : > { %1777 = vmatpush.msrb.mxu3 %v1567_v42  ;;  %v1327_v42 = vmax.f32 %v1175_v47, 0.0  ;;  %v1497_v16 = vmin.f32 %v1337_v33, 6.0 }
 0x1df   : > { %1758 = vmatpush.msrb.mxu2 %v1556_v15  ;;  %v1317_v15 = vmax.f32 %v1173_v0, 0.0  ;;  %v1486_v55 = vmin.f32 %v1326_v11, 6.0 }
 0x1e0   : > { %1778 = vmatpush.msrb.mxu3 %v1557_v28  ;;  %v1487_v19 = vmin.f32 %v1327_v42, 6.0  ;;  %v1476_v28 = vmin.f32 %v1316_v34, 6.0 }
 0x1e1   : > { %1759 = vmatpush.msrb.mxu2 %v1546_v46  ;;  %v1477_v54 = vmin.f32 %v1317_v15, 6.0  ;;  %v3499_v15 = vld [vmem:[%s5202_s4 + $0x78] sm:$0xff] }
 0x1e2   : > { %1779 = vmatpush.msrb.mxu3 %v1547_v22  ;;  %v4850_v8 = vpop.f32.mrf.mxu0 }
 0x1e3   : > { %1760 = vmatpush.msrb.mxu2 %v1536_v26  ;;  %v4854_v40 = vpop.f32.mrf.mxu1 }
 0x1e4   : > { %1780 = vmatpush.msrb.mxu3 %v1537_v13 }
 0x1e5   : > { %1761 = vmatpush.msrb.mxu2 %v1526_v31 }
 0x1e6   : > { %1781 = vmatpush.msrb.mxu3 %v1527_v7 }
 0x1e7   : > { %1762 = vmatpush.msrb.mxu2 %v1516_v14 }
 0x1e8   : > { %1782 = vmatpush.msrb.mxu3 %v1517_v51 }
 0x1e9   : > { %1763 = vmatpush.msrb.mxu2 %v1506_v57 }
 0x1ea   : > { %1783 = vmatpush.msrb.mxu3 %v1507_v4  ;;  %v4860_v45 = vpop.f32.mrf.mxu0 }
 0x1eb   : > { %1764 = vmatpush.msrb.mxu2 %v1496_v30  ;;  %v4862_v43 = vpop.f32.mrf.mxu1  ;;  %v3491_v30 = vld [vmem:[%s5202_s4 + $0x38] sm:$0xff] }
 0x1ec   : > { %1784 = vmatpush.msrb.mxu3 %v1497_v16 }
 0x1ed   : > { %1765 = vmatpush.msrb.mxu2 %v1486_v55 }
 0x1ee   : > { %1785 = vmatpush.msrb.mxu3 %v1487_v19 }
 0x1ef   : > { %1766 = vmatpush.msrb.mxu2 %v1476_v28 }
 0x1f0   : > { %1786 = vmatpush.msrb.mxu3 %v1477_v54  ;;  %1767 = vmatmul.f32.vlgmr.msrb.gmra.mxu2 %v4676_v24 }
 0x1f1   : > { %1787 = vmatmul.f32.vlgmr.msrb.gmra.mxu3 %v4676_v24  ;;  %2485 = vmatpush.bf16.msra.mxu2 %v3491_v30 }
 0x1f2   : > { %v1241_v37 = vpop.f32.mrf.mxu0  ;;  %2498 = vmatpush.bf16.msra.mxu3 %v3499_v15 }
 0x1f3   : > { %v1290_v46 = vpop.f32.mrf.mxu1 }
 0x1fa   : > { %v1243_v44 = vpop.f32.mrf.mxu0 }
 0x1fb   : > { %v1292_v52 = vpop.f32.mrf.mxu1  ;;  %v1244_v28 = vadd.f32 %v1243_v44, %v4869_v53  ;;  %v1242_v44 = vadd.f32 %v1241_v37, %v4869_v53  ;;  %v1288_v37 = vadd.f32 %v4862_v43, %v4871_v27  ;;  %v1234_v43 = vadd.f32 %v4830_v10, %v4869_v53 }
 0x1fc   : > { %v1232_v10 = vadd.f32 %v4813_v60, %v4869_v53  ;;  %v3487_v60 = vld [vmem:[%s5202_s4 + $0x18] sm:$0xff] }
 0x202   : > { %v1246_v22 = vpop.f32.mrf.mxu0 }
 0x203   : > { %v1295_v23 = vpop.f32.mrf.mxu1  ;;  %v1247_v42 = vadd.f32 %v1246_v22, %v4869_v53 }
 0x204   : > { %v1296_v16 = vadd.f32 %v1295_v23, %v4871_v27  ;;  %v3498_v23 = vld [vmem:[%s5202_s4 + $0x70] sm:$0xff] }
 0x205   : > { %2499 = vmatpush.bf16.msra.mxu3 %v3498_v23 }
 0x20a   : > { %v1248_v17 = vpop.f32.mrf.mxu0 }
 0x20b   : > { %v1297_v48 = vpop.f32.mrf.mxu1  ;;  %v1249_v3 = vadd.f32 %v1248_v17, %v4869_v53  ;;  %v3490_v17 = vld [vmem:[%s5202_s4 + $0x30] sm:$0xff] }
 0x20c   : > { %v1298_v51 = vadd.f32 %v1297_v48, %v4871_v27  ;;  %v1293_v48 = vadd.f32 %v1292_v52, %v4871_v27  ;;  %v1239_v52 = vadd.f32 %v4860_v45, %v4869_v53  ;;  %2486 = vmatpush.bf16.msra.mxu2 %v3490_v17  ;;  %v1237_v45 = vadd.f32 %v4850_v8, %v4869_v53  ;;  %v3488_v8 = vld [vmem:[%s5202_s4 + $0x20] sm:$0xff] }
 0x20d   : > { %v1428_v54 = vmax.f32 %v1249_v3, 0.0 }
 0x212   : > { %v1251_v26 = vpop.f32.mrf.mxu0 }
 0x213   : > { %v1300_v21 = vpop.f32.mrf.mxu1  ;;  %v1252_v32 = vadd.f32 %v1251_v26, %v4869_v53  ;;  %v1429_v26 = vmax.f32 %v1298_v51, 0.0  ;;  %v1281_v51 = vadd.f32 %v4818_v36, %v4871_v27  ;;  %v3495_v36 = vld [vmem:[%s5202_s4 + $0x58] sm:$0xff] }
 0x214   : > { %v1301_v25 = vadd.f32 %v1300_v21, %v4871_v27 }
 0x215   : > { %v1438_v4 = vmax.f32 %v1252_v32, 0.0 }
 0x216   : > { %v1439_v55 = vmax.f32 %v1301_v25, 0.0 }
 0x218   : > { %v1599_v39 = vmin.f32 %v1439_v55, 6.0 }
 0x21a   : > { %v1253_v20 = vpop.f32.mrf.mxu0 }
 0x21b   : > { %v1302_v58 = vpop.f32.mrf.mxu1  ;;  %v1254_v29 = vadd.f32 %v1253_v20, %v4869_v53  ;;  %v1418_v20 = vmax.f32 %v1247_v42, 0.0  ;;  %v1368_v42 = vmax.f32 %v1234_v43, 0.0  ;;  %v3515_v43 = vld [vmem:[%s5202_s4 + $0xf8] sm:$0xff] }
 0x21c   : > { %v1303_v50 = vadd.f32 %v1302_v58, %v4871_v27  ;;  %v1598_v58 = vmin.f32 %v1438_v4, 6.0 }
 0x21d   : > { %v1448_v0 = vmax.f32 %v1254_v29, 0.0  ;;  %v1409_v29 = vmax.f32 %v1293_v48, 0.0  ;;  %v1528_v17 = vmin.f32 %v1368_v42, 6.0  ;;  %v1273_v48 = vadd.f32 %v4746_v56, %v4871_v27  ;;  %v3503_v42 = vld [vmem:[%s5202_s4 + $0x98] sm:$0xff] }
 0x21e   : > { %v1449_v11 = vmax.f32 %v1303_v50, 0.0  ;;  %v1578_v50 = vmin.f32 %v1418_v20, 6.0  ;;  %v1271_v20 = vadd.f32 %v4722_v1, %v4871_v27 }
 0x21f   : > { %v1608_v22 = vmin.f32 %v1448_v0, 6.0  ;;  %v1569_v3 = vmin.f32 %v1409_v29, 6.0  ;;  %v1378_v0 = vmax.f32 %v1237_v45, 0.0  ;;  %v1648_v45 = vpop.f32.mrf.mxu2 }
 0x220   : > { %v1609_v21 = vmin.f32 %v1449_v11, 6.0 }
 0x221   : > { %v1538_v55 = vmin.f32 %v1378_v0, 6.0  ;;  %v3513_v0 = vld [vmem:[%s5202_s4 + $0xe8] sm:$0xff] }
 0x222   : > { %v1256_v13 = vpop.f32.mrf.mxu0 }
 0x223   : > { %v1305_v6 = vpop.f32.mrf.mxu1  ;;  %v1257_v18 = vadd.f32 %v1256_v13, %v4869_v53  ;;  %v1291_v13 = vadd.f32 %v1290_v46, %v4871_v27  ;;  %v3497_v46 = vld [vmem:[%s5202_s4 + $0x68] sm:$0xff] }
 0x224   : > { %v1306_v63 = vadd.f32 %v1305_v6, %v4871_v27  ;;  %v1419_v6 = vmax.f32 %v1296_v16, 0.0  ;;  %2500 = vmatpush.bf16.msra.mxu3 %v3497_v46  ;;  %v1358_v16 = vmax.f32 %v1232_v10, 0.0  ;;  %v3523_v46 = vld [vmem:[%s5202_s4 + $0x138] sm:$0xff]  ;;  %v3529_v10 = vld [vmem:[%s5202_s4 + $0x168] sm:$0xff] }
 0x225   : > { %v1458_v7 = vmax.f32 %v1257_v18, 0.0  ;;  %v1408_v18 = vmax.f32 %v1244_v28, 0.0  ;;  %v1399_v32 = vmax.f32 %v1291_v13, 0.0  ;;  %v1359_v28 = vmax.f32 %v1281_v51, 0.0  ;;  %v3504_v51 = vld [vmem:[%s5202_s4 + $0xa0] sm:$0xff] }
 0x226   : > { %v1459_v59 = vmax.f32 %v1306_v63, 0.0  ;;  %v1588_v63 = vmin.f32 %v1428_v54, 6.0 }
 0x227   : > { %v1618_v34 = vmin.f32 %v1458_v7, 6.0  ;;  %v1579_v7 = vmin.f32 %v1419_v6, 6.0  ;;  %v1568_v25 = vmin.f32 %v1408_v18, 6.0  ;;  %v1519_v13 = vmin.f32 %v1359_v28, 6.0  ;;  %v3525_v28 = vld [vmem:[%s5202_s4 + $0x148] sm:$0xff] }
 0x228   : > { %v1619_v19 = vmin.f32 %v1459_v59, 6.0  ;;  %v1283_v59 = vadd.f32 %v4834_v5, %v4871_v27  ;;  %v1229_v5 = vadd.f32 %v4790_v2, %v4869_v53  ;;  %v1227_v2 = vadd.f32 %v4765_v61, %v4869_v53  ;;  %v3486_v61 = vld [vmem:[%s5202_s4 + $0x10] sm:$0xff] }
 0x22a   : > { %v1258_v38 = vpop.f32.mrf.mxu0  ;;  %v1369_v30 = vmax.f32 %v1283_v59, 0.0  ;;  %v1338_v23 = vmax.f32 %v1227_v2, 0.0  ;;  %v3506_v59 = vld [vmem:[%s5202_s4 + $0xb0] sm:$0xff] }
 0x22b   : > { %v1259_v49 = vadd.f32 %v1258_v38, %v4869_v53  ;;  %v1307_v31 = vpop.f32.mrf.mxu1  ;;  %v3489_v38 = vld [vmem:[%s5202_s4 + $0x28] sm:$0xff]  ;;  %v3526_v2 = vld [vmem:[%s5202_s4 + $0x150] sm:$0xff] }
 0x22c   : > { %v1308_v47 = vadd.f32 %v1307_v31, %v4871_v27  ;;  %v1398_v31 = vmax.f32 %v1242_v44, 0.0  ;;  %2487 = vmatpush.bf16.msra.mxu2 %v3489_v38  ;;  %v1518_v44 = vmin.f32 %v1358_v16, 6.0  ;;  %v3510_v16 = vld [vmem:[%s5202_s4 + $0xd0] sm:$0xff] }
 0x22d   : > { %v1468_v35 = vmax.f32 %v1259_v49, 0.0  ;;  %v1589_v49 = vmin.f32 %v1429_v26, 6.0 }
 0x22e   : > { %v1469_v14 = vmax.f32 %v1308_v47, 0.0  ;;  %v1286_v47 = vadd.f32 %v4854_v40, %v4871_v27  ;;  %v3496_v40 = vld [vmem:[%s5202_s4 + $0x60] sm:$0xff] }
 0x22f   : > { %v1628_v33 = vmin.f32 %v1468_v35, 6.0  ;;  %v1388_v35 = vmax.f32 %v1239_v52, 0.0  ;;  %2501 = vmatpush.bf16.msra.mxu3 %v3496_v40  ;;  %v1329_v52 = vmax.f32 %v1273_v48, 0.0  ;;  %v3505_v40 = vld [vmem:[%s5202_s4 + $0xa8] sm:$0xff]  ;;  %v3524_v48 = vld [vmem:[%s5202_s4 + $0x140] sm:$0xff] }
 0x230   : > { %v1629_v57 = vmin.f32 %v1469_v14, 6.0  ;;  %v1389_v14 = vmax.f32 %v1288_v37, 0.0  ;;  %v1379_v11 = vmax.f32 %v1286_v47, 0.0  ;;  %2488 = vmatpush.bf16.msra.mxu2 %v3488_v8  ;;  %v3484_v37 = vld [vmem:[%s5202_s4] sm:$0xff]  ;;  %v3507_v47 = vld [vmem:[%s5202_s4 + $0xb8] sm:$0xff] }
 0x231   : > { %1791 = vmatpush.msrb.mxu0 %v1628_v33  ;;  %v1558_v33 = vmin.f32 %v1398_v31, 6.0  ;;  %v1548_v4 = vmin.f32 %v1388_v35, 6.0  ;;  %v1489_v29 = vmin.f32 %v1329_v52, 6.0  ;;  %v1831_v35 = vpack.c.bf16 %v1648_v45, %v1648_v45  ;;  %v3546_v52 = vld [vmem:[%s5202_s4 + $0x1f0] sm:$0xff]  ;;  %v3543_v45 = vld [vmem:[%s5202_s4 + $0x1d8] sm:$0xff] }
 0x232   : > { %1811 = vmatpush.msrb.mxu1 %v1629_v57  ;;  %v1559_v57 = vmin.f32 %v1399_v32, 6.0  ;;  %v1549_v15 = vmin.f32 %v1389_v14, 6.0  ;;  %v1539_v54 = vmin.f32 %v1379_v11, 6.0  ;;  %v1668_v32 = vpop.f32.mrf.mxu3  ;;  %v3530_v14 = vld [vmem:[%s5202_s4 + $0x170] sm:$0xff]  ;;  %v3528_v11 = vld [vmem:[%s5202_s4 + $0x160] sm:$0xff] }
 0x233   : > { %1792 = vmatpush.msrb.mxu0 %v1618_v34  ;;  %v1278_v34 = vadd.f32 %v4794_v9, %v4871_v27  ;;  %v1224_v9 = vadd.f32 %v4742_v62, %v4869_v53  ;;  %2502 = vmatpush.bf16.msra.mxu3 %v3495_v36  ;;  %v1222_v62 = vadd.f32 %v4718_v12, %v4869_v53  ;;  %v3493_v12 = vld [vmem:[%s5202_s4 + $0x48] sm:$0xff]  ;;  %v1498_v53 = vmin.f32 %v1338_v23, 6.0  ;;  %v3547_v23 = vld [vmem:[%s5202_s4 + $0x1f8] sm:$0xff] }
 0x234   : > { %1812 = vmatpush.msrb.mxu1 %v1619_v19  ;;  %v1276_v19 = vadd.f32 %v4772_v41, %v4871_v27  ;;  %2489 = vmatpush.bf16.msra.mxu2 %v3487_v60  ;;  %v3494_v41 = vld [vmem:[%s5202_s4 + $0x50] sm:$0xff]  ;;  %v1319_v27 = vmax.f32 %v1271_v20, 0.0  ;;  %v1832_v8 = vpack.c.bf16 %v1668_v32, %v1668_v32  ;;  %v3511_v60 = vld [vmem:[%s5202_s4 + $0xd8] sm:$0xff] }
 0x235   : > { %1793 = vmatpush.msrb.mxu0 %v1608_v22  ;;  %v1348_v22 = vmax.f32 %v1229_v5, 0.0  ;;  %v1349_v26 = vmax.f32 %v1278_v34, 0.0  ;;  %v1328_v56 = vmax.f32 %v1224_v9, 0.0  ;;  %v1318_v1 = vmax.f32 %v1222_v62, 0.0  ;;  %v3519_v5 = vld [vmem:[%s5202_s4 + $0x118] sm:$0xff]  ;;  %v1688_v34 = vpop.f32.mrf.mxu2  ;;  %v3516_v9 = vld [vmem:[%s5202_s4 + $0x100] sm:$0xff] }
 0x236   : > { %1813 = vmatpush.msrb.mxu1 %v1609_v21  ;;  %v1529_v21 = vmin.f32 %v1369_v30, 6.0  ;;  %v1479_v31 = vmin.f32 %v1319_v27, 6.0  ;;  %v3518_v30 = vld [vmem:[%s5202_s4 + $0x110] sm:$0xff]  ;;  %v1833_v20 = vpack.c.bf16 %v1688_v34, %v1688_v34  ;;  %v3552_v27 = vld [vmem:[%s5202_s4 + $0x220] sm:$0xff] }
 0x237   : > { %1794 = vmatpush.msrb.mxu0 %v1598_v58  ;;  %v1339_v58 = vmax.f32 %v1276_v19, 0.0  ;;  %v1508_v6 = vmin.f32 %v1348_v22, 6.0  ;;  %v1509_v18 = vmin.f32 %v1349_v26, 6.0  ;;  %2503 = vmatpush.bf16.msra.mxu3 %v3494_v41  ;;  %v1488_v38 = vmin.f32 %v1328_v56, 6.0  ;;  %v3501_v19 = vld [vmem:[%s5202_s4 + $0x88] sm:$0xff]  ;;  %v3555_v22 = vld [vmem:[%s5202_s4 + $0x238] sm:$0xff] }
 0x238   : > { %1814 = vmatpush.msrb.mxu1 %v1599_v39  ;;  %2490 = vmatpush.bf16.msra.mxu2 %v3486_v61  ;;  %v3485_v39 = vld [vmem:[%s5202_s4 + $0x8] sm:$0xff]  ;;  %v3539_v26 = vld [vmem:[%s5202_s4 + $0x1b8] sm:$0xff]  ;;  %v3508_v41 = vld [vmem:[%s5202_s4 + $0xc0] sm:$0xff] }
 0x239   : > { %1795 = vmatpush.msrb.mxu0 %v1588_v63  ;;  %v1499_v63 = vmin.f32 %v1339_v58, 6.0  ;;  %v3554_v58 = vld [vmem:[%s5202_s4 + $0x230] sm:$0xff] }
 0x23a   : > { %1815 = vmatpush.msrb.mxu1 %v1589_v49  ;;  %v1478_v49 = vmin.f32 %v1318_v1, 6.0  ;;  %v1708_v36 = vpop.f32.mrf.mxu3  ;;  %v3561_v1 = vld [vmem:[%s5202_s4 + $0x268] sm:$0xff]  ;;  %v3542_v32 = vld [vmem:[%s5202_s4 + $0x1d0] sm:$0xff] }
 0x23b   : > { %1796 = vmatpush.msrb.mxu0 %v1578_v50  ;;  %2504 = vmatpush.bf16.msra.mxu3 %v3493_v12  ;;  %v3492_v50 = vld [vmem:[%s5202_s4 + $0x40] sm:$0xff]  ;;  %v3537_v12 = vld [vmem:[%s5202_s4 + $0x1a8] sm:$0xff] }
 0x23c   : > { %1816 = vmatpush.msrb.mxu1 %v1579_v7  ;;  %2491 = vmatpush.bf16.msra.mxu2 %v3485_v39  ;;  %v3531_v7 = vld [vmem:[%s5202_s4 + $0x178] sm:$0xff]  ;;  %v3562_v39 = vld [vmem:[%s5202_s4 + $0x270] sm:$0xff] }
 0x23d   : > { %1797 = vmatpush.msrb.mxu0 %v1568_v25  ;;  %v3522_v25 = vld [vmem:[%s5202_s4 + $0x130] sm:$0xff] }
 0x23e   : > { %1817 = vmatpush.msrb.mxu1 %v1569_v3  ;;  %v3521_v3 = vld [vmem:[%s5202_s4 + $0x128] sm:$0xff] }
 0x23f   : > { %1798 = vmatpush.msrb.mxu0 %v1558_v33  ;;  %2505 = vmatpush.bf16.msra.mxu3 %v3492_v50  ;;  %v3520_v33 = vld [vmem:[%s5202_s4 + $0x120] sm:$0xff]  ;;  %v3534_v50 = vld [vmem:[%s5202_s4 + $0x190] sm:$0xff] }
 0x240   : > { %1818 = vmatpush.msrb.mxu1 %v1559_v57  ;;  %2492 = vmatpush.bf16.msra.mxu2 %v3484_v37  ;;  %v3512_v57 = vld [vmem:[%s5202_s4 + $0xe0] sm:$0xff] }
 0x241   : > { %1799 = vmatpush.msrb.mxu0 %v1548_v4  ;;  %v3527_v4 = vld [vmem:[%s5202_s4 + $0x158] sm:$0xff]  ;;  %v3544_v37 = vld [vmem:[%s5202_s4 + $0x1e0] sm:$0xff] }
 0x242   : > { %1819 = vmatpush.msrb.mxu1 %v1549_v15  ;;  %2506 = vmatmul.bf16.vlgmr.msra.gmra.mxu3 %v1832_v8  ;;  %v3502_v15 = vld [vmem:[%s5202_s4 + $0x90] sm:$0xff] }
 0x243   : > { %1800 = vmatpush.msrb.mxu0 %v1538_v55  ;;  %2550 = vmatpush.bf16.msrb.mxu3 %v3531_v7  ;;  %v3517_v55 = vld [vmem:[%s5202_s4 + $0x108] sm:$0xff] }
 0x244   : > { %1820 = vmatpush.msrb.mxu1 %v1539_v54  ;;  %2537 = vmatpush.bf16.msrb.mxu2 %v3523_v46  ;;  %v3509_v54 = vld [vmem:[%s5202_s4 + $0xc8] sm:$0xff]  ;;  %v3559_v46 = vld [vmem:[%s5202_s4 + $0x258] sm:$0xff] }
 0x245   : > { %1801 = vmatpush.msrb.mxu0 %v1528_v17  ;;  %2493 = vmatmul.bf16.vlgmr.msra.gmra.mxu2 %v1831_v35  ;;  %v3500_v17 = vld [vmem:[%s5202_s4 + $0x80] sm:$0xff]  ;;  %v3549_v7 = vld [vmem:[%s5202_s4 + $0x208] sm:$0xff] }
 0x246   : > { %1821 = vmatpush.msrb.mxu1 %v1529_v21  ;;  %v3563_v21 = vld [vmem:[%s5202_s4 + $0x278] sm:$0xff]  ;;  %v3557_v35 = vld [vmem:[%s5202_s4 + $0x248] sm:$0xff] }
 0x247   : > { %1802 = vmatpush.msrb.mxu0 %v1518_v44  ;;  %2551 = vmatpush.bf16.msrb.mxu3 %v3530_v14 }
 0x248   : > { %1822 = vmatpush.msrb.mxu1 %v1519_v13  ;;  %2538 = vmatpush.bf16.msrb.mxu2 %v3522_v25  ;;  %v3538_v13 = vld [vmem:[%s5202_s4 + $0x1b0] sm:$0xff]  ;;  %v3541_v25 = vld [vmem:[%s5202_s4 + $0x1c8] sm:$0xff] }
 0x249   : > { %1803 = vmatpush.msrb.mxu0 %v1508_v6  ;;  %v1834_v6 = vpack.c.bf16 %v1708_v36, %v1708_v36 }
 0x24a   : > { %1823 = vmatpush.msrb.mxu1 %v1509_v18  ;;  %v3553_v18 = vld [vmem:[%s5202_s4 + $0x228] sm:$0xff] }
 0x24b   : > { %1804 = vmatpush.msrb.mxu0 %v1498_v53  ;;  %2552 = vmatpush.bf16.msrb.mxu3 %v3529_v10  ;;  %v3545_v53 = vld [vmem:[%s5202_s4 + $0x1e8] sm:$0xff]  ;;  %v3548_v10 = vld [vmem:[%s5202_s4 + $0x200] sm:$0xff] }
 0x24c   : > { %1824 = vmatpush.msrb.mxu1 %v1499_v63  ;;  %2539 = vmatpush.bf16.msrb.mxu2 %v3521_v3  ;;  %v3536_v63 = vld [vmem:[%s5202_s4 + $0x1a0] sm:$0xff] }
 0x24d   : > { %1805 = vmatpush.msrb.mxu0 %v1488_v38  ;;  %v3560_v38 = vld [vmem:[%s5202_s4 + $0x260] sm:$0xff] }
 0x24e   : > { %1825 = vmatpush.msrb.mxu1 %v1489_v29  ;;  %v3551_v29 = vld [vmem:[%s5202_s4 + $0x218] sm:$0xff] }
 0x24f   : > { %1806 = vmatpush.msrb.mxu0 %v1478_v49  ;;  %2553 = vmatpush.bf16.msrb.mxu3 %v3528_v11  ;;  %v3535_v49 = vld [vmem:[%s5202_s4 + $0x198] sm:$0xff] }
 0x250   : > { %1826 = vmatpush.msrb.mxu1 %v1479_v31  ;;  %1807 = vmatmul.f32.vlgmr.msrb.gmra.mxu0 %v4676_v24  ;;  %v3550_v31 = vld [vmem:[%s5202_s4 + $0x210] sm:$0xff] }
 0x251   : > { %1827 = vmatmul.f32.vlgmr.msrb.gmra.mxu1 %v4676_v24  ;;  %2511 = vmatpush.bf16.msra.mxu0 %v3507_v47  ;;  %v3514_v24 = vld [vmem:[%s5202_s4 + $0xf0] sm:$0xff] }
 0x252   : > { %2524 = vmatpush.bf16.msra.mxu1 %v3515_v43  ;;  %2540 = vmatpush.bf16.msrb.mxu2 %v3520_v33  ;;  %v3558_v47 = vld [vmem:[%s5202_s4 + $0x250] sm:$0xff]  ;;  %v3533_v43 = vld [vmem:[%s5202_s4 + $0x188] sm:$0xff] }
 0x253   : > { %2554 = vmatpush.bf16.msrb.mxu3 %v3527_v4  ;;  %v1728_v61 = vpop.f32.mrf.mxu2 }
 0x254   : > { %v1748_v62 = vpop.f32.mrf.mxu3  ;;  %v1835_v44 = vpack.c.bf16 %v1728_v61, %v1728_v61 }
 0x255   : > { %2512 = vmatpush.bf16.msra.mxu0 %v3506_v59  ;;  %v1836_v56 = vpack.c.bf16 %v1748_v62, %v1748_v62  ;;  %v3532_v59 = vld [vmem:[%s5202_s4 + $0x180] sm:$0xff] }
 0x256   : > { %2525 = vmatpush.bf16.msra.mxu1 %v3514_v24  ;;  %2541 = vmatpush.bf16.msrb.mxu2 %v3519_v5  ;;  %v3540_v24 = vld [vmem:[%s5202_s4 + $0x1c0] sm:$0xff] }
 0x257   : > { %2555 = vmatpush.bf16.msrb.mxu3 %v3526_v2  ;;  %v3603_v5 = vld [vmem:[%s5203_s5] ss:$0 sm:$0xff] }
 0x259   : > { %2513 = vmatpush.bf16.msra.mxu0 %v3505_v40 }
 0x25a   : > { %2526 = vmatpush.bf16.msra.mxu1 %v3513_v0  ;;  %2542 = vmatpush.bf16.msrb.mxu2 %v3518_v30  ;;  %v3556_v0 = vld [vmem:[%s5202_s4 + $0x240] sm:$0xff] }
 0x25b   : > { %2556 = vmatpush.bf16.msrb.mxu3 %v3525_v28 }
 0x25d   : > { %2514 = vmatpush.bf16.msra.mxu0 %v3504_v51 }
 0x25e   : > { %2527 = vmatpush.bf16.msra.mxu1 %v3512_v57  ;;  %2543 = vmatpush.bf16.msrb.mxu2 %v3517_v55 }
 0x25f   : > { %2557 = vmatpush.bf16.msrb.mxu3 %v3524_v48 }
 0x261   : > { %2515 = vmatpush.bf16.msra.mxu0 %v3503_v42 }
 0x262   : > { %2528 = vmatpush.bf16.msra.mxu1 %v3511_v60  ;;  %2544 = vmatpush.bf16.msrb.mxu2 %v3516_v9 }
 0x263   : > { %2602 = vmatpush.bf16.msra.mxu3 %v3563_v21 }
 0x264   : > { %2558 = vmatmul.bf16.vlgmr.msrb.gmra.mxu3 %v1836_v56 }
 0x265   : > { %2516 = vmatpush.bf16.msra.mxu0 %v3502_v15  ;;  %2545 = vmatmul.bf16.vlgmr.msrb.gmra.mxu2 %v1835_v44 }
 0x266   : > { %2529 = vmatpush.bf16.msra.mxu1 %v3510_v16  ;;  %2589 = vmatpush.bf16.msra.mxu2 %v3555_v22 }
 0x267   : > { %2603 = vmatpush.bf16.msra.mxu3 %v3562_v39 }
 0x269   : > { %2517 = vmatpush.bf16.msra.mxu0 %v3501_v19 }
 0x26a   : > { %2530 = vmatpush.bf16.msra.mxu1 %v3509_v54  ;;  %2590 = vmatpush.bf16.msra.mxu2 %v3554_v58 }
 0x26b   : > { %2604 = vmatpush.bf16.msra.mxu3 %v3561_v1 }
 0x26d   : > { %2518 = vmatpush.bf16.msra.mxu0 %v3500_v17 }
 0x26e   : > { %2531 = vmatpush.bf16.msra.mxu1 %v3508_v41  ;;  %2591 = vmatpush.bf16.msra.mxu2 %v3553_v18 }
 0x26f   : > { %2605 = vmatpush.bf16.msra.mxu3 %v3560_v38 }
 0x270   : > { %2519 = vmatmul.bf16.vlgmr.msra.gmra.mxu0 %v1833_v20 }
 0x271   : > { %2563 = vmatpush.bf16.msrb.mxu0 %v3539_v26  ;;  %2532 = vmatmul.bf16.vlgmr.msra.gmra.mxu1 %v1834_v6 }
 0x272   : > { %2576 = vmatpush.bf16.msrb.mxu1 %v3547_v23  ;;  %2592 = vmatpush.bf16.msra.mxu2 %v3552_v27 }
 0x273   : > { %2606 = vmatpush.bf16.msra.mxu3 %v3559_v46  ;;  %v1768_v8 = vpop.f32.mrf.mxu2 }
 0x274   : > { %v1788_v14 = vpop.f32.mrf.mxu3  ;;  %v1837_v3 = vpack.c.bf16 %v1768_v8, %v1768_v8 }
 0x275   : > { %2564 = vmatpush.bf16.msrb.mxu0 %v3538_v13  ;;  %v1838_v40 = vpack.c.bf16 %v1788_v14, %v1788_v14 }
 0x276   : > { %2577 = vmatpush.bf16.msrb.mxu1 %v3546_v52  ;;  %2593 = vmatpush.bf16.msra.mxu2 %v3551_v29 }
 0x277   : > { %2607 = vmatpush.bf16.msra.mxu3 %v3558_v47 }
 0x279   : > { %2565 = vmatpush.bf16.msrb.mxu0 %v3537_v12 }
 0x27a   : > { %2578 = vmatpush.bf16.msrb.mxu1 %v3545_v53  ;;  %2594 = vmatpush.bf16.msra.mxu2 %v3550_v31 }
 0x27b   : > { %2608 = vmatpush.bf16.msra.mxu3 %v3557_v35 }
 0x27d   : > { %2566 = vmatpush.bf16.msrb.mxu0 %v3536_v63 }
 0x27e   : > { %2579 = vmatpush.bf16.msrb.mxu1 %v3544_v37  ;;  %2595 = vmatpush.bf16.msra.mxu2 %v3549_v7 }
 0x27f   : > { %2609 = vmatpush.bf16.msra.mxu3 %v3556_v0 }
 0x281   : > { %2567 = vmatpush.bf16.msrb.mxu0 %v3535_v49 }
 0x282   : > { %2580 = vmatpush.bf16.msrb.mxu1 %v3543_v45  ;;  %2596 = vmatpush.bf16.msra.mxu2 %v3548_v10 }
 0x285   : > { %2568 = vmatpush.bf16.msrb.mxu0 %v3534_v50 }
 0x286   : > { %2581 = vmatpush.bf16.msrb.mxu1 %v3542_v32 }
 0x289   : > { %2569 = vmatpush.bf16.msrb.mxu0 %v3533_v43 }
 0x28a   : > { %2582 = vmatpush.bf16.msrb.mxu1 %v3541_v25 }
 0x28d   : > { %2570 = vmatpush.bf16.msrb.mxu0 %v3532_v59 }
 0x28e   : > { %2583 = vmatpush.bf16.msrb.mxu1 %v3540_v24 }
 0x290   : > { %2571 = vmatmul.bf16.vlgmr.msrb.gmra.mxu0 %v1837_v3 }
 0x291   : > { %2584 = vmatmul.bf16.vlgmr.msrb.gmra.mxu1 %v1838_v40 }
 0x2c5   : > { %v2507_v60 = vpop.f32.mrf.mxu3 }
 0x2c8   : > { %v2494_v42 = vpop.f32.mrf.mxu2 }
 0x2c9   : > { %v2495_v4 = vadd.f32 %v3603_v5, %v2494_v42 }
 0x2cb   : > { %v2508_v34 = vadd.f32 %v2507_v60, %v2495_v4 }
 0x2cd   : > { %v1808_v33 = vpop.f32.mrf.mxu0  ;;  %v2509_v15 = vpop.f32.mrf.mxu3 }
 0x2ce   : > { %v1839_v51 = vpack.c.bf16 %v1808_v33, %v1808_v33  ;;  %v1828_v11 = vpop.f32.mrf.mxu1 }
 0x2cf   : > { %v1840_v57 = vpack.c.bf16 %v1828_v11, %v1828_v11 }
 0x2d0   : > { %2597 = vmatmul.bf16.vlgmr.msra.gmra.mxu2 %v1839_v51  ;;  %v2496_v30 = vpop.f32.mrf.mxu2 }
 0x2d1   : > { %2610 = vmatmul.bf16.vlgmr.msra.gmra.mxu3 %v1840_v57 }
 0x2e7   : > { %v2559_v54 = vpop.f32.mrf.mxu3 }
 0x2e8   : > { %v2546_v19 = vpop.f32.mrf.mxu2 }
 0x2ed   : > { %v2520_v36 = vpop.f32.mrf.mxu0 }
 0x2ee   : > { %v2521_v2 = vadd.f32 %v2520_v36, %v2508_v34  ;;  %v2533_v16 = vpop.f32.mrf.mxu1 }
 0x2ef   : > { %v2561_v48 = vpop.f32.mrf.mxu3 }
 0x2f0   : > { %v2534_v55 = vadd.f32 %v2533_v16, %v2521_v2  ;;  %v2548_v61 = vpop.f32.mrf.mxu2 }
 0x2f2   : > { %v2547_v28 = vadd.f32 %v2546_v19, %v2534_v55 }
 0x2f4   : > { %v2560_v9 = vadd.f32 %v2559_v54, %v2547_v28 }
 0x2f5   : > { %v2522_v22 = vpop.f32.mrf.mxu0 }
 0x2f6   : > { %v2535_v17 = vpop.f32.mrf.mxu1 }
 0x30d   : > { %v2572_v26 = vpop.f32.mrf.mxu0 }
 0x30e   : > { %v2573_v21 = vadd.f32 %v2572_v26, %v2560_v9  ;;  %v2585_v41 = vpop.f32.mrf.mxu1 }
 0x310   : > { %v2586_v62 = vadd.f32 %v2585_v41, %v2573_v21 }
 0x315   : > { %v2574_v23 = vpop.f32.mrf.mxu0 }
 0x316   : > { %v2587_v44 = vpop.f32.mrf.mxu1 }
 0x353   : > { %v2598_v20 = vpop.f32.mrf.mxu2 }
 0x354   : > { %v2599_v58 = vadd.f32 %v2598_v20, %v2586_v62  ;;  %v2611_v13 = vpop.f32.mrf.mxu3 }
 0x356   : > { %v2612_v56 = vadd.f32 %v2611_v13, %v2599_v58 }
 0x358   : > { %2615 = vmax.xlane.f32.xlu0 %v2612_v56 }
 0x35b   : > { %v2600_v6 = vpop.f32.mrf.mxu2 }
 0x35c   : > { %v2613_v39 = vpop.f32.mrf.mxu3 }
 0x3cb   : > { %v2616_v52 = vpop.xlane.xlu0 %2615 }
 0x3cc   : > { %v2617_v18 = vsub.f32 %v2612_v56, %v2616_v52 }
 0x3ce   : > { %v2618_v12 = vmul.f32 1.442695, %v2617_v18 }
 0x3d0   : > { %3604 = vpow2.f32 %v2618_v12 }
 0x3d6   : > { %v3605_v1 = vpop.eup %3604 }
 0x3d7   : > { %2620 = vadd.xlane.f32.xlu0 %v3605_v1 }
 0x44a   : > { %v2621_v53 = vpop.xlane.xlu0 %2620 }
 0x44b   : > { %3606 = vrcp.f32 %v2621_v53  ;;  %v2633_v37 = vand.u32 2147483648, %v2621_v53  ;;  %v2631_v49 = vand.u32 2147483647, %v2621_v53  ;;  %vm2627_vm1 = vweird.f32 %v2621_v53 }
 0x44d   : > { %v2634_v45 = vor.u32 1.1754944e-38, %v2633_v37  ;;  %vm2632_vm3 = vcmp.eq.f32.partialorder %v2631_v49, 8.507059e+37 }
 0x451   : > { %v3607_v27 = vpop.eup %3606 }
 0x452   : > { %v2623_v63 = vmul.f32 %v3607_v27, %v2621_v53  ;;  %vm2628_vm0 = vweird.f32 %v3607_v27 }
 0x453   : > { %vm2629_vm2 = vmor %vm2627_vm1, %vm2628_vm0 }
 0x454   : > { %v2624_v38 = vsub.f32 1.0, %v2623_v63 }
 0x456   : > { %v2625_v29 = vmul.f32 %v3607_v27, %v2624_v38 }
 0x458   : > { %v2626_v46 = vadd.f32 %v3607_v27, %v2625_v29 }
 0x45a   : > { %v2630_v31 = vsel %vm2629_vm2, %v3607_v27, %v2626_v46 }
 0x45b   : > { %v2635_v50 = vsel %vm2632_vm3, %v2634_v45, %v2630_v31 }
 0x45c   : > { %v2636_v47 = vmul.f32 %v3605_v1, %v2635_v50 }
 0x45e   : > { %2637 = vst [vmem:[%s245_s18] sm:$0xff] %v2636_v47 }
 0x45f   : > { %3641 = shalt.err (!%p3638_p3)
}
 0x460   : > { %3564 = dma.vmem_to_hbm [thread:$0]  (%p3751_p5), %s2652_s19, 128, %s2654_s20, %s2639_s25  }
 0x461 PF: > { %p3570_p4 = scmp.ge.s32.totalorder %s3676_s24, 2  ;;  %s2665_s12 = sand.u32 1, %s3664_s21  }
 0x462   : > { %s2666_s13 = scalar_lea.sflag [#allocation3], %s2665_s12 }
 0x463   : > { %p3567_p7 = pnand %p3570_p4, %p3755_p6 }
 0x465   : > { %p3568_p8 = pneg %p3567_p7 }
 0x467   : > { %3659 = dma.done.wait (%p3568_p8), %s2666_s13, 128  }
 0x468   : > { %3661 = vsyncadd (%p3568_p8), %s2666_s13, 4294967168  ;;  %p16_p9 = scmp.ge.s32.totalorder %s3738_s27, 4   ;;  %s5264_s21 = smov %s3668_s22 }
 0x469   : > { %s5265_s22 = smov %s3672_s23  ;;  %s5266_s23 = smov %s3749_s30 }
 0x46a   : > { %s5267_s24 = smov %s3738_s27  ;;  %18 = sbr.rel (!%p16_p9) target bundleno = 3 (0x3), region = 79 }
 0x46f   :  { %2672 = vsyncpa [#allocation3], 1 }
 0x470   :  { %2674 = vsyncpa [#allocation3 + $0x1], 1 }

</bundles_post_ra>
